<compile_context>
chip_gen: v7x
topology: tpu7x:2x2x1
jax: 0.10.0
libtpu: 0.0.40
codegen_flags: <defaults>
</compile_context>

<pallas_src>
import functools

import jax
import jax.numpy as jnp
from jax import lax
from jax.experimental import pallas as pl
from jax.experimental.pallas import tpu as pltpu

TEMPERATURE = 1.0
NORMALIZE = True
WEIGHTS = 1.0
LARGE_NUM = 1.0e9
NORM_EPS = 1.0e-12          # matches torch.nn.functional.normalize eps
NEG_INIT = -1.0e30          # finite "-inf" for the online-LSE running max


def _round_up(x, m):
    return ((x + m - 1) // m) * m


def _normalize_rows(x):
    # x / max(||x||, eps)  ==  x * rsqrt(max(||x||^2, eps^2))
    ss = jnp.sum(x * x, axis=1, keepdims=True)
    return x * lax.rsqrt(jnp.maximum(ss, NORM_EPS * NORM_EPS))


# ---------------------------------------------------------------------------
# Pallas kernel: flash-style tiled NT-Xent with online logsumexp.
#   grid = (row_tiles, col_tiles); scratch m/s/pos persist across col steps.
# ---------------------------------------------------------------------------
def _ntxent_kernel(h_q_ref, p_q_ref, h_k_ref, loss_ref,
                   m_sc, s_sc, pos_sc,
                   *, inv_t, normalize, n_valid, tq, tk, mxu_dtype):
    qi = pl.program_id(0)
    ki = pl.program_id(1)
    nk = pl.num_programs(1)

    q = h_q_ref[...].astype(jnp.float32)          # (tq, D)
    k = h_k_ref[...].astype(jnp.float32)          # (tk, D)
    if normalize:
        q = _normalize_rows(q)
        k = _normalize_rows(k)

    @pl.when(ki == 0)
    def _init():
        m_sc[...] = jnp.full_like(m_sc, NEG_INIT)
        s_sc[...] = jnp.zeros_like(s_sc)
        # Positive logit: row-wise dot of H-row with its partner row (h1·h2).
        p = p_q_ref[...].astype(jnp.float32)
        if normalize:
            p = _normalize_rows(p)
        pos_sc[...] = jnp.sum(q * p, axis=1, keepdims=True) * inv_t

    # (tq, tk) similarity tile on the MXU — contract on D for both operands,
    # no transpose materialized.
    s = lax.dot_general(q.astype(mxu_dtype), k.astype(mxu_dtype),
                        (((1,), (1,)), ((), ())),
                        preferred_element_type=jnp.float32) * inv_t

    # Single mask: self-similarity diagonal + padded (invalid) columns.
    row_g = qi * tq + lax.broadcasted_iota(jnp.int32, (tq, tk), 0)
    col_g = ki * tk + lax.broadcasted_iota(jnp.int32, (tq, tk), 1)
    invalid = (row_g == col_g) | (col_g >= n_valid)
    s = s - jnp.where(invalid, LARGE_NUM, 0.0)

    # Online logsumexp update.
    m_prev = m_sc[...]
    m_new = jnp.maximum(m_prev, jnp.max(s, axis=1, keepdims=True))
    s_sc[...] = (s_sc[...] * jnp.exp(m_prev - m_new)
                 + jnp.sum(jnp.exp(s - m_new), axis=1, keepdims=True))
    m_sc[...] = m_new

    @pl.when(ki == nk - 1)
    def _finalize():
        lse = jnp.log(s_sc[...]) + m_sc[...]          # (tq, 1)
        loss_row = lse - pos_sc[...]                  # cross-entropy per row
        row_idx = qi * tq + lax.broadcasted_iota(jnp.int32, (tq, 1), 0)
        loss_ref[...] = jnp.where(row_idx < n_valid, loss_row, 0.0)


def ntxent_loss_pallas_raw(h1, h2, temperature=TEMPERATURE,
                           normalize=NORMALIZE, weights=WEIGHTS,
                           mxu_bf16=None):
    h1 = h1.astype(jnp.float32)
    h2 = h2.astype(jnp.float32)
    B, D = h1.shape
    N = 2 * B

    H = jnp.concatenate([h1, h2], axis=0)   # rows of the fused logits matrix
    P = jnp.concatenate([h2, h1], axis=0)   # positive partner of each H row

    # Tile size: lane-dense multiple of 128; 256 feeds the v6e/v7x 256-wide MXU.
    T = 128 if N <= 128 else 256
    n_pad = _round_up(N, T)
    if n_pad != N:
        H = jnp.pad(H, ((0, n_pad - N), (0, 0)))
        P = jnp.pad(P, ((0, n_pad - N), (0, 0)))

    if mxu_bf16 is None:
        mxu_bf16 = D >= 256          # negligible precision impact for cosine sims
    mxu_dtype = jnp.bfloat16 if mxu_bf16 else jnp.float32

    grid = (n_pad // T, n_pad // T)

    kernel = functools.partial(
        _ntxent_kernel, inv_t=1.0 / float(temperature), normalize=normalize,
        n_valid=N, tq=T, tk=T, mxu_dtype=mxu_dtype)

    # Rough per-step VMEM need (3 double-buffered (T, D) inputs + temporaries);
    # keep an explicit, modest scoped-VMEM ceiling (fits v7x's 64 MiB physical).
    vmem_est = (3 * 2 * T * D + 6 * T * T + 16 * T) * 4
    vmem_limit = int(min(100 * 2**20, max(32 * 2**20, 2 * vmem_est)))

    per_row = pl.pallas_call(
        kernel,
        out_shape=jax.ShapeDtypeStruct((n_pad, 1), jnp.float32),
        grid_spec=pltpu.PrefetchScalarGridSpec(
            num_scalar_prefetch=0,
            grid=grid,
            in_specs=[pl.BlockSpec((T, D), lambda qi, ki: (qi, 0)),   # H row tile
                      pl.BlockSpec((T, D), lambda qi, ki: (qi, 0)),   # P row tile
                      pl.BlockSpec((T, D), lambda qi, ki: (ki, 0))],  # H col tile
            out_specs=pl.BlockSpec((T, 1), lambda qi, ki: (qi, 0)),
            scratch_shapes=[pltpu.VMEM((T, 1), jnp.float32),   # running max m
                            pltpu.VMEM((T, 1), jnp.float32),   # running sum s
                            pltpu.VMEM((T, 1), jnp.float32)]), # positive logit
        compiler_params=pltpu.CompilerParams(
            dimension_semantics=("parallel", "arbitrary"),
            vmem_limit_bytes=vmem_limit),
        cost_estimate=pl.CostEstimate(
            flops=int(2 * n_pad * n_pad * D + 8 * n_pad * D),
            transcendentals=int(n_pad * n_pad + 2 * n_pad),
            bytes_accessed=int((grid[0] + 2) * n_pad * D * 4 + n_pad * 4)),
    )(H, P, H)

    return jnp.sum(per_row) * (float(weights) / N)


# ---------------------------------------------------------------------------
# Pure-JAX reference (used for the backward pass and correctness checks).
# ---------------------------------------------------------------------------
def ntxent_loss_ref(h1, h2, temperature=TEMPERATURE,
                    normalize=NORMALIZE, weights=WEIGHTS):
    h1 = h1.astype(jnp.float32)
    h2 = h2.astype(jnp.float32)
    if normalize:
        h1 = h1 / jnp.maximum(jnp.linalg.norm(h1, axis=1, keepdims=True), NORM_EPS)
        h2 = h2 / jnp.maximum(jnp.linalg.norm(h2, axis=1, keepdims=True), NORM_EPS)
    B = h1.shape[0]
    eye = jnp.eye(B, dtype=jnp.float32)
    laa = h1 @ h1.T / temperature - eye * LARGE_NUM
    lbb = h2 @ h2.T / temperature - eye * LARGE_NUM
    lab = h1 @ h2.T / temperature
    lba = h2 @ h1.T / temperature
    logits = jnp.concatenate(
        [jnp.concatenate([lab, laa], axis=1),
         jnp.concatenate([lba, lbb], axis=1)], axis=0)          # (2B, 2B)
    targets = jnp.concatenate([jnp.arange(B), jnp.arange(B)])
    lse = jax.scipy.special.logsumexp(logits, axis=1)
    loss = lse - logits[jnp.arange(2 * B), targets]
    return jnp.mean(loss * weights)


# Forward via Pallas kernel, backward via the pure-JAX reference.
# TODO(synk): pallas_call is not auto-differentiable; a dedicated Pallas
#             backward reusing saved residuals (normalized H, per-row LSE)
#             would be the next-order win for training.
@jax.custom_vjp
def ntxent_loss(h1, h2):
    return ntxent_loss_pallas_raw(h1, h2)


def _ntxent_fwd(h1, h2):
    return ntxent_loss_pallas_raw(h1, h2), (h1, h2)


def _ntxent_bwd(res, g):
    h1, h2 = res
    _, vjp = jax.vjp(ntxent_loss_ref, h1, h2)
    dh1, dh2 = vjp(g)
    return dh1, dh2


ntxent_loss.defvjp(_ntxent_fwd, _ntxent_bwd)


# ---------------------------------------------------------------------------
# Simple deterministic "model": a Linear layer (glue, plain JAX).
# ---------------------------------------------------------------------------
def model_apply(params, x):
    return x @ params["W"] + params["b"]


def ntxent_forward(params, x1, x2):
    """Mirrors NTXentLoss.forward: (loss, gradients w.r.t. model params)."""
    def loss_fn(p):
        h1 = model_apply(p, x1)
        h2 = model_apply(p, x2)
        return ntxent_loss(h1, h2)
    loss, grads = jax.value_and_grad(loss_fn)(params)
    return loss, grads


if __name__ == "__main__":
    B, F_IN, D_HID = 8, 16, 32

    key = jax.random.PRNGKey(0)
    k1, k2, kw, kb = jax.random.split(key, 4)
    x1 = jax.random.normal(k1, (B, F_IN), dtype=jnp.float32)
    x2 = jax.random.normal(k2, (B, F_IN), dtype=jnp.float32)

    # Deterministic model parameters (Linear F_IN -> D_HID).
    params = {
        "W": jax.random.normal(kw, (F_IN, D_HID), dtype=jnp.float32) * 0.1,
        "b": jax.random.normal(kb, (D_HID,), dtype=jnp.float32) * 0.01,
    }

    loss, grads = ntxent_forward(params, x1, x2)
    loss = jax.block_until_ready(loss)
    grads = jax.block_until_ready(grads)

    # Sanity check kernel loss against the pure-JAX reference.
    h1 = model_apply(params, x1)
    h2 = model_apply(params, x2)
    ref = jax.block_until_ready(ntxent_loss_ref(h1, h2))
    assert jnp.allclose(loss, ref, atol=1e-4, rtol=1e-4), (loss, ref)

    # Extra check: multi-tile path (grid > 1x1, padding + online LSE).
    kb1, kb2 = jax.random.split(jax.random.PRNGKey(1))
    hb1 = jax.random.normal(kb1, (160, 64), dtype=jnp.float32)
    hb2 = jax.random.normal(kb2, (160, 64), dtype=jnp.float32)
    big = jax.block_until_ready(ntxent_loss_pallas_raw(hb1, hb2))
    big_ref = jax.block_until_ready(ntxent_loss_ref(hb1, hb2))
    assert jnp.allclose(big, big_ref, atol=1e-4, rtol=1e-4), (big, big_ref)

    print("KERNEL_OK")
</pallas_src>

<mosaic_0001>
module attributes {stable_mosaic.version = 11 : i64} {
  func.func @_ntxent_kernel(%arg0: i32, %arg1: i32, %arg2: memref<128x32xf32, #tpu.memory_space<vmem>>, %arg3: memref<128x32xf32, #tpu.memory_space<vmem>>, %arg4: memref<128x32xf32, #tpu.memory_space<vmem>>, %arg5: memref<128x1xf32, #tpu.memory_space<vmem>>, %arg6: memref<128x1xf32, #tpu.memory_space<vmem>>, %arg7: memref<128x1xf32, #tpu.memory_space<vmem>>, %arg8: memref<128x1xf32, #tpu.memory_space<vmem>>) attributes {dimension_semantics = [#tpu.dimension_semantics<parallel>, #tpu.dimension_semantics<arbitrary>], iteration_bounds = array<i64: 1, 1>, scalar_prefetch = 0 : i64, scratch_operands = 3 : i64, tpu.core_type = #tpu.core_type<tc>, window_params = [{transform_indices = @transform_0, window_bounds = array<i64: 128, 32>}, {transform_indices = @transform_1, window_bounds = array<i64: 128, 32>}, {transform_indices = @transform_2, window_bounds = array<i64: 128, 32>}, {transform_indices = @transform_3, window_bounds = array<i64: 128, 1>}]} {
    %c0 = arith.constant 0 : index
    %c0_0 = arith.constant 0 : index
    %0 = vector.load %arg2[%c0, %c0_0] : memref<128x32xf32, #tpu.memory_space<vmem>>, vector<128x32xf32>
    %c0_1 = arith.constant 0 : index
    %c0_2 = arith.constant 0 : index
    %1 = vector.load %arg4[%c0_1, %c0_2] : memref<128x32xf32, #tpu.memory_space<vmem>>, vector<128x32xf32>
    %2 = arith.mulf %0, %0 : vector<128x32xf32>
    %cst = arith.constant dense<0.000000e+00> : vector<128xf32>
    %3 = vector.multi_reduction <add>, %2, %cst [1] : vector<128x32xf32> to vector<128xf32>
    %4 = vector.shape_cast %3 : vector<128xf32> to vector<128x1xf32>
    %cst_3 = arith.constant 1.000000e-24 : f32
    %5 = vector.broadcast %cst_3 : f32 to vector<128x1xf32>
    %6 = arith.maximumf %4, %5 : vector<128x1xf32>
    %7 = math.rsqrt %6 : vector<128x1xf32>
    %8 = vector.broadcast %7 : vector<128x1xf32> to vector<128x32xf32>
    %9 = arith.mulf %0, %8 : vector<128x32xf32>
    %10 = arith.mulf %1, %1 : vector<128x32xf32>
    %cst_4 = arith.constant dense<0.000000e+00> : vector<128xf32>
    %11 = vector.multi_reduction <add>, %10, %cst_4 [1] : vector<128x32xf32> to vector<128xf32>
    %12 = vector.shape_cast %11 : vector<128xf32> to vector<128x1xf32>
    %cst_5 = arith.constant 1.000000e-24 : f32
    %13 = vector.broadcast %cst_5 : f32 to vector<128x1xf32>
    %14 = arith.maximumf %12, %13 : vector<128x1xf32>
    %15 = math.rsqrt %14 : vector<128x1xf32>
    %16 = vector.broadcast %15 : vector<128x1xf32> to vector<128x32xf32>
    %17 = arith.mulf %1, %16 : vector<128x32xf32>
    %c0_i32 = arith.constant 0 : i32
    %18 = arith.cmpi eq, %arg1, %c0_i32 : i32
    %19 = arith.extui %18 : i1 to i32
    %c0_i32_6 = arith.constant 0 : i32
    %20 = arith.cmpi ne, %19, %c0_i32_6 : i32
    scf.if %20 {
      %cst_24 = arith.constant -1.000000e+30 : f32
      %59 = vector.broadcast %cst_24 : f32 to vector<128x1xf32>
      %c0_25 = arith.constant 0 : index
      %c0_26 = arith.constant 0 : index
      %60 = vector.load %arg6[%c0_25, %c0_26] : memref<128x1xf32, #tpu.memory_space<vmem>>, vector<128x1xf32>
      tpu.vector_store %arg6[%c0_25, %c0_26], %59 {strides = array<i32>} : memref<128x1xf32, #tpu.memory_space<vmem>>, vector<128x1xf32>,
      %cst_27 = arith.constant 0.000000e+00 : f32
      %61 = vector.broadcast %cst_27 : f32 to vector<128x1xf32>
      %c0_28 = arith.constant 0 : index
      %c0_29 = arith.constant 0 : index
      %62 = vector.load %arg7[%c0_28, %c0_29] : memref<128x1xf32, #tpu.memory_space<vmem>>, vector<128x1xf32>
      tpu.vector_store %arg7[%c0_28, %c0_29], %61 {strides = array<i32>} : memref<128x1xf32, #tpu.memory_space<vmem>>, vector<128x1xf32>,
      %c0_30 = arith.constant 0 : index
      %c0_31 = arith.constant 0 : index
      %63 = vector.load %arg3[%c0_30, %c0_31] : memref<128x32xf32, #tpu.memory_space<vmem>>, vector<128x32xf32>
      %64 = arith.mulf %63, %63 : vector<128x32xf32>
      %cst_32 = arith.constant dense<0.000000e+00> : vector<128xf32>
      %65 = vector.multi_reduction <add>, %64, %cst_32 [1] : vector<128x32xf32> to vector<128xf32>
      %66 = vector.shape_cast %65 : vector<128xf32> to vector<128x1xf32>
      %cst_33 = arith.constant 1.000000e-24 : f32
      %67 = vector.broadcast %cst_33 : f32 to vector<128x1xf32>
      %68 = arith.maximumf %66, %67 : vector<128x1xf32>
      %69 = math.rsqrt %68 : vector<128x1xf32>
      %70 = vector.broadcast %69 : vector<128x1xf32> to vector<128x32xf32>
      %71 = arith.mulf %63, %70 : vector<128x32xf32>
      %72 = arith.mulf %9, %71 : vector<128x32xf32>
      %cst_34 = arith.constant dense<0.000000e+00> : vector<128xf32>
      %73 = vector.multi_reduction <add>, %72, %cst_34 [1] : vector<128x32xf32> to vector<128xf32>
      %74 = vector.shape_cast %73 : vector<128xf32> to vector<128x1xf32>
      %cst_35 = arith.constant 1.000000e+00 : f32
      %75 = vector.broadcast %cst_35 : f32 to vector<128x1xf32>
      %76 = arith.mulf %74, %75 : vector<128x1xf32>
      %c0_36 = arith.constant 0 : index
      %c0_37 = arith.constant 0 : index
      %77 = vector.load %arg8[%c0_36, %c0_37] : memref<128x1xf32, #tpu.memory_space<vmem>>, vector<128x1xf32>
      tpu.vector_store %arg8[%c0_36, %c0_37], %76 {strides = array<i32>} : memref<128x1xf32, #tpu.memory_space<vmem>>, vector<128x1xf32>,
    } else {
    }
    %cst_7 = arith.constant dense<0.000000e+00> : vector<128x128xf32>
    %21 = tpu.matmul %9, %17, %cst_7 {dimension_numbers = #tpu.dot_dimension_numbers<[1], [1], [0], [0], [0, 0, 1, 0], [], []>} : vector<128x32xf32>, vector<128x32xf32>, vector<128x128xf32> -> vector<128x128xf32>
    %cst_8 = arith.constant 1.000000e+00 : f32
    %22 = vector.broadcast %cst_8 : f32 to vector<128x128xf32>
    %23 = arith.mulf %21, %22 : vector<128x128xf32>
    %c128_i32 = arith.constant 128 : i32
    %24 = arith.muli %arg0, %c128_i32 : i32
    %25 = tpu.iota {dimensions = array<i32: 0>} : vector<128x128xi32>
    %26 = vector.broadcast %24 : i32 to vector<128x128xi32>
    %27 = arith.addi %26, %25 : vector<128x128xi32>
    %c128_i32_9 = arith.constant 128 : i32
    %28 = arith.muli %arg1, %c128_i32_9 : i32
    %29 = tpu.iota {dimensions = array<i32: 1>} : vector<128x128xi32>
    %30 = vector.broadcast %28 : i32 to vector<128x128xi32>
    %31 = arith.addi %30, %29 : vector<128x128xi32>
    %32 = arith.cmpi eq, %27, %31 : vector<128x128xi32>
    %c16_i32 = arith.constant 16 : i32
    %33 = vector.broadcast %c16_i32 : i32 to vector<128x128xi32>
    %34 = arith.cmpi sge, %31, %33 : vector<128x128xi32>
    %35 = arith.ori %32, %34 : vector<128x128xi1>
    %cst_10 = arith.constant 1.000000e+09 : f32
    %cst_11 = arith.constant 0.000000e+00 : f32
    %36 = vector.broadcast %cst_10 : f32 to vector<128x128xf32>
    %37 = vector.broadcast %cst_11 : f32 to vector<128x128xf32>
    %38 = arith.select %35, %36, %37 : vector<128x128xi1>, vector<128x128xf32>
    %39 = arith.subf %23, %38 : vector<128x128xf32>
    %c0_12 = arith.constant 0 : index
    %c0_13 = arith.constant 0 : index
    %40 = vector.load %arg6[%c0_12, %c0_13] : memref<128x1xf32, #tpu.memory_space<vmem>>, vector<128x1xf32>
    %cst_14 = arith.constant dense<0xFF800000> : vector<128xf32>
    %41 = vector.multi_reduction <maximumf>, %39, %cst_14 [1] : vector<128x128xf32> to vector<128xf32>
    %42 = vector.shape_cast %41 : vector<128xf32> to vector<128x1xf32>
    %43 = arith.maximumf %40, %42 : vector<128x1xf32>
    %c0_15 = arith.constant 0 : index
    %c0_16 = arith.constant 0 : index
    %44 = vector.load %arg7[%c0_15, %c0_16] : memref<128x1xf32, #tpu.memory_space<vmem>>, vector<128x1xf32>
    %45 = arith.subf %40, %43 : vector<128x1xf32>
    %46 = math.exp %45 : vector<128x1xf32>
    %47 = arith.mulf %44, %46 : vector<128x1xf32>
    %48 = vector.broadcast %43 : vector<128x1xf32> to vector<128x128xf32>
    %49 = arith.subf %39, %48 : vector<128x128xf32>
    %50 = math.exp %49 : vector<128x128xf32>
    %cst_17 = arith.constant dense<0.000000e+00> : vector<128xf32>
    %51 = vector.multi_reduction <add>, %50, %cst_17 [1] : vector<128x128xf32> to vector<128xf32>
    %52 = vector.shape_cast %51 : vector<128xf32> to vector<128x1xf32>
    %53 = arith.addf %47, %52 : vector<128x1xf32>
    %c0_18 = arith.constant 0 : index
    %c0_19 = arith.constant 0 : index
    %54 = vector.load %arg7[%c0_18, %c0_19] : memref<128x1xf32, #tpu.memory_space<vmem>>, vector<128x1xf32>
    tpu.vector_store %arg7[%c0_18, %c0_19], %53 {strides = array<i32>} : memref<128x1xf32, #tpu.memory_space<vmem>>, vector<128x1xf32>,
    %c0_20 = arith.constant 0 : index
    %c0_21 = arith.constant 0 : index
    %55 = vector.load %arg6[%c0_20, %c0_21] : memref<128x1xf32, #tpu.memory_space<vmem>>, vector<128x1xf32>
    tpu.vector_store %arg6[%c0_20, %c0_21], %43 {strides = array<i32>} : memref<128x1xf32, #tpu.memory_space<vmem>>, vector<128x1xf32>,
    %c0_i32_22 = arith.constant 0 : i32
    %56 = arith.cmpi eq, %arg1, %c0_i32_22 : i32
    %57 = arith.extui %56 : i1 to i32
    %c0_i32_23 = arith.constant 0 : i32
    %58 = arith.cmpi ne, %57, %c0_i32_23 : i32
    scf.if %58 {
      %c0_24 = arith.constant 0 : index
      %c0_25 = arith.constant 0 : index
      %59 = vector.load %arg7[%c0_24, %c0_25] : memref<128x1xf32, #tpu.memory_space<vmem>>, vector<128x1xf32>
      %60 = math.log %59 : vector<128x1xf32>
      %c0_26 = arith.constant 0 : index
      %c0_27 = arith.constant 0 : index
      %61 = vector.load %arg6[%c0_26, %c0_27] : memref<128x1xf32, #tpu.memory_space<vmem>>, vector<128x1xf32>
      %62 = arith.addf %60, %61 : vector<128x1xf32>
      %c0_28 = arith.constant 0 : index
      %c0_29 = arith.constant 0 : index
      %63 = vector.load %arg8[%c0_28, %c0_29] : memref<128x1xf32, #tpu.memory_space<vmem>>, vector<128x1xf32>
      %64 = arith.subf %62, %63 : vector<128x1xf32>
      %c128_i32_30 = arith.constant 128 : i32
      %65 = arith.muli %arg0, %c128_i32_30 : i32
      %66 = tpu.iota {dimensions = array<i32: 0>} : vector<128x1xi32>
      %67 = vector.broadcast %65 : i32 to vector<128x1xi32>
      %68 = arith.addi %67, %66 : vector<128x1xi32>
      %c16_i32_31 = arith.constant 16 : i32
      %69 = vector.broadcast %c16_i32_31 : i32 to vector<128x1xi32>
      %70 = arith.cmpi slt, %68, %69 : vector<128x1xi32>
      %cst_32 = arith.constant 0.000000e+00 : f32
      %71 = vector.broadcast %cst_32 : f32 to vector<128x1xf32>
      %72 = arith.select %70, %64, %71 : vector<128x1xi1>, vector<128x1xf32>
      %c0_33 = arith.constant 0 : index
      %c0_34 = arith.constant 0 : index
      %73 = vector.load %arg5[%c0_33, %c0_34] : memref<128x1xf32, #tpu.memory_space<vmem>>, vector<128x1xf32>
      tpu.vector_store %arg5[%c0_33, %c0_34], %72 {strides = array<i32>} : memref<128x1xf32, #tpu.memory_space<vmem>>, vector<128x1xf32>,
    } else {
    }
    return
  }
  func.func @transform_0(%arg0: i32, %arg1: i32) -> (i32, i32) {
    %c0_i32 = arith.constant 0 : i32
    %c0_i32_0 = arith.constant 0 : i32
    return %arg0, %c0_i32 : i32, i32
  }
  func.func @transform_1(%arg0: i32, %arg1: i32) -> (i32, i32) {
    %c0_i32 = arith.constant 0 : i32
    %c0_i32_0 = arith.constant 0 : i32
    return %arg0, %c0_i32 : i32, i32
  }
  func.func @transform_2(%arg0: i32, %arg1: i32) -> (i32, i32) {
    %c0_i32 = arith.constant 0 : i32
    %c0_i32_0 = arith.constant 0 : i32
    return %arg1, %c0_i32 : i32, i32
  }
  func.func @transform_3(%arg0: i32, %arg1: i32) -> (i32, i32) {
    %c0_i32 = arith.constant 0 : i32
    %c0_i32_0 = arith.constant 0 : i32
    return %arg0, %c0_i32 : i32, i32
  }
}

</mosaic_0001>

<bundles_post_ra>
// kernel: tpu_custom_call.1
= control target key start
LH: loop header
LB: loop body
LE: loop exit
PB: predicated region body
PF: predicated region fallthrough
CT: control target
= control target key end

     0   :  { %vm62_vm0 = vcmask 261120   ;;  %vm275_vm2 = vcmask 7168   ;;  %s2879_s2 = inlined_call_operand.vmem [shape: f32[128,32], index: 2, kind: input, shape index: {}]   ;;  %s2880_s0 = inlined_call_operand.vmem [shape: f32[128,32], index: 0, kind: input, shape index: {}]   ;;  %s2881_s1 = inlined_call_operand.vmem [shape: f32[128,32], index: 1, kind: input, shape index: {}]   ;;  %s2882_s3 = inlined_call_operand.vmem [shape: f32[128,1], index: 3, kind: output, shape index: {}]  }
   0x1   :  { %v1762_v0 = vld [vmem:[%s2879_s2 + $0x10] sm:$0xff]  ;;  %v1767_v1 = vld [vmem:[%s2879_s2] sm:$0xff]  ;;  %v1772_v2 = vld [vmem:[%s2879_s2 + $0x18] sm:$0xff] }
   0x2   :  { %v161_v3 = vmul.f32 %v1762_v0, %v1762_v0  ;;  %v159_v4 = vmul.f32 %v1767_v1, %v1767_v1  ;;  %v162_v5 = vmul.f32 %v1772_v2, %v1772_v2  ;;  %v1783_v6 = vld [vmem:[%s2879_s2 + $0x8] sm:$0xff]  ;;  %v1795_v9 = vld [vmem:[%s2879_s2 + $0x20] sm:$0xff]  ;;  %v1808_v16 = vld [vmem:[%s2879_s2 + $0x38] sm:$0xff] }
   0x3   :  { %v160_v7 = vmul.f32 %v1783_v6, %v1783_v6  ;;  %v1790_v8 = vld [vmem:[%s2879_s2 + $0x28] sm:$0xff]  ;;  %v163_v15 = vmul.f32 %v1795_v9, %v1795_v9  ;;  %v1813_v17 = vld [vmem:[%s2879_s2 + $0x30] sm:$0xff]  ;;  %v166_v20 = vmul.f32 %v1808_v16, %v1808_v16  ;;  %v1829_v23 = vld [vmem:[%s2879_s2 + $0x40] sm:$0xff] }
   0x4   :  { %v181_v10 = vsel %vm62_vm0, %v161_v3, 0.0  ;;  %v175_v11 = vsel %vm62_vm0, %v159_v4, 0.0  ;;  %v184_v12 = vsel %vm62_vm0, %v162_v5, 0.0  ;;  %v164_v14 = vmul.f32 %v1790_v8, %v1790_v8  ;;  %v1824_v22 = vld [vmem:[%s2879_s2 + $0x48] sm:$0xff]  ;;  %v1840_v28 = vld [vmem:[%s2879_s2 + $0x58] sm:$0xff]  ;;  %v1845_v29 = vld [vmem:[%s2879_s2 + $0x50] sm:$0xff] }
   0x5   :  { %182 = vadd.xlane.f32.xlu1 %v181_v10  ;;  %176 = vadd.xlane.f32.xlu0 %v175_v11  ;;  %v178_v13 = vsel %vm62_vm0, %v160_v7, 0.0  ;;  %v187_v19 = vsel %vm62_vm0, %v163_v15, 0.0  ;;  %v165_v21 = vmul.f32 %v1813_v17, %v1813_v17  ;;  %v196_v24 = vsel %vm62_vm0, %v166_v20, 0.0  ;;  %v1856_v34 = vld [vmem:[%s2879_s2 + $0x68] sm:$0xff]  ;;  %v1861_v35 = vld [vmem:[%s2879_s2 + $0x60] sm:$0xff]  ;;  %v1872_v40 = vld [vmem:[%s2879_s2 + $0x78] sm:$0xff] }
   0x6   :  { %v190_v18 = vsel %vm62_vm0, %v164_v14, 0.0  ;;  %v168_v26 = vmul.f32 %v1824_v22, %v1824_v22  ;;  %v167_v27 = vmul.f32 %v1829_v23, %v1829_v23  ;;  %v170_v32 = vmul.f32 %v1840_v28, %v1840_v28  ;;  %v1877_v41 = vld [vmem:[%s2879_s2 + $0x70] sm:$0xff]  ;;  %v1888_v46 = vld [vmem:[%s2880_s0 + $0x8] sm:$0xff]  ;;  %v1893_v47 = vld [vmem:[%s2880_s0] sm:$0xff] }
   0x7   :  { %v193_v25 = vsel %vm62_vm0, %v165_v21, 0.0  ;;  %v169_v33 = vmul.f32 %v1845_v29, %v1845_v29  ;;  %v172_v38 = vmul.f32 %v1856_v34, %v1856_v34  ;;  %v171_v39 = vmul.f32 %v1861_v35, %v1861_v35  ;;  %v1904_v52 = vld [vmem:[%s2880_s0 + $0x48] sm:$0xff]  ;;  %v1909_v53 = vld [vmem:[%s2880_s0 + $0x40] sm:$0xff]  ;;  %v1920_v58 = vld [vmem:[%s2880_s0 + $0x50] sm:$0xff] }
   0x8   :  { %v202_v30 = vsel %vm62_vm0, %v168_v26, 0.0  ;;  %v199_v31 = vsel %vm62_vm0, %v167_v27, 0.0  ;;  %v208_v36 = vsel %vm62_vm0, %v170_v32, 0.0  ;;  %v174_v44 = vmul.f32 %v1872_v40, %v1872_v40  ;;  %v1925_v59 = vld [vmem:[%s2880_s0 + $0x10] sm:$0xff]  ;;  %v1936_v3 = vld [vmem:[%s2880_s0 + $0x58] sm:$0xff]  ;;  %v1968_v20 = vld [vmem:[%s2880_s0 + $0x68] sm:$0xff] }
   0x9   :  { %185 = vadd.xlane.f32.xlu1 %v184_v12  ;;  %179 = vadd.xlane.f32.xlu0 %v178_v13  ;;  %v205_v37 = vsel %vm62_vm0, %v169_v33, 0.0  ;;  %v214_v42 = vsel %vm62_vm0, %v172_v38, 0.0  ;;  %v211_v43 = vsel %vm62_vm0, %v171_v39, 0.0  ;;  %v173_v45 = vmul.f32 %v1877_v41, %v1877_v41  ;;  %v1941_v4 = vld [vmem:[%s2880_s0 + $0x18] sm:$0xff]  ;;  %v1952_v12 = vld [vmem:[%s2880_s0 + $0x60] sm:$0xff]  ;;  %v1973_v21 = vld [vmem:[%s2880_s0 + $0x28] sm:$0xff] }
   0xa   :  { %v220_v48 = vsel %vm62_vm0, %v174_v44, 0.0  ;;  %v47_v50 = vmul.f32 %v1888_v46, %v1888_v46  ;;  %v46_v51 = vmul.f32 %v1893_v47, %v1893_v47  ;;  %v55_v56 = vmul.f32 %v1904_v52, %v1904_v52  ;;  %v1957_v13 = vld [vmem:[%s2880_s0 + $0x20] sm:$0xff]  ;;  %v2000_v38 = vld [vmem:[%s2880_s0 + $0x78] sm:$0xff]  ;;  %vm2121_vm1 = vmpackc.low %vm62_vm0, %vm62_vm0 }
   0xb   :  { %v217_v49 = vsel %vm62_vm0, %v173_v45, 0.0  ;;  %v54_v57 = vmul.f32 %v1909_v53, %v1909_v53  ;;  %v56_v62 = vmul.f32 %v1920_v58, %v1920_v58  ;;  %v48_v63 = vmul.f32 %v1925_v59, %v1925_v59  ;;  %v2005_v39 = vld [vmem:[%s2880_s0 + $0x38] sm:$0xff] }
   0xc   :  { %v66_v54 = vsel %vm62_vm0, %v47_v50, 0.0  ;;  %v63_v55 = vsel %vm62_vm0, %v46_v51, 0.0  ;;  %v90_v60 = vsel %vm62_vm0, %v55_v56, 0.0  ;;  %v57_v10 = vmul.f32 %v1936_v3, %v1936_v3  ;;  %v2032_v56 = vld [vmem:[%s2881_s1 + $0x18] sm:$0xff] }
   0xd   :  { %191 = vadd.xlane.f32.xlu1 %v190_v18  ;;  %188 = vadd.xlane.f32.xlu0 %v187_v19  ;;  %v87_v61 = vsel %vm62_vm0, %v54_v57, 0.0  ;;  %v93_v5 = vsel %vm62_vm0, %v56_v62, 0.0  ;;  %v69_v7 = vsel %vm62_vm0, %v48_v63, 0.0  ;;  %v49_v11 = vmul.f32 %v1941_v4, %v1941_v4  ;;  %v2037_v57 = vld [vmem:[%s2881_s1 + $0x10] sm:$0xff] }
   0xe   :  { %v96_v14 = vsel %vm62_vm0, %v57_v10, 0.0  ;;  %v58_v18 = vmul.f32 %v1952_v12, %v1952_v12  ;;  %v50_v19 = vmul.f32 %v1957_v13, %v1957_v13  ;;  %v59_v26 = vmul.f32 %v1968_v20, %v1968_v20 }
   0xf   :  { %v72_v15 = vsel %vm62_vm0, %v49_v11, 0.0  ;;  %v51_v27 = vmul.f32 %v1973_v21, %v1973_v21  ;;  %v61_v44 = vmul.f32 %v2000_v38, %v2000_v38  ;;  %v53_v45 = vmul.f32 %v2005_v39, %v2005_v39 }
  0x10   :  { %v102_v32 = vsel %vm62_vm0, %v59_v26, 0.0  ;;  %v327_v62 = vmul.f32 %v2032_v56, %v2032_v56  ;;  %v326_v63 = vmul.f32 %v2037_v57, %v2037_v57 }
  0x11   :  { %197 = vadd.xlane.f32.xlu1 %v196_v24  ;;  %194 = vadd.xlane.f32.xlu0 %v193_v25  ;;  %v99_v24 = vsel %vm62_vm0, %v58_v18, 0.0  ;;  %v75_v25 = vsel %vm62_vm0, %v50_v19, 0.0  ;;  %v78_v33 = vsel %vm62_vm0, %v51_v27, 0.0  ;;  %v108_v50 = vsel %vm62_vm0, %v61_v44, 0.0  ;;  %v2064_v18 = vld [vmem:[%s2881_s1 + $0x38] sm:$0xff]  ;;  %v2069_v19 = vld [vmem:[%s2881_s1 + $0x30] sm:$0xff] }
  0x12   :  { %v84_v51 = vsel %vm62_vm0, %v53_v45, 0.0  ;;  %v349_v10 = vsel %vm62_vm0, %v327_v62, 0.0  ;;  %v346_v11 = vsel %vm62_vm0, %v326_v63, 0.0  ;;  %v331_v26 = vmul.f32 %v2064_v18, %v2064_v18  ;;  %v2096_v44 = vld [vmem:[%s2881_s1 + $0x50] sm:$0xff] }
  0x13   :  { %v330_v27 = vmul.f32 %v2069_v19, %v2069_v19 }
  0x15   :  { %203 = vadd.xlane.f32.xlu1 %v202_v30  ;;  %200 = vadd.xlane.f32.xlu0 %v199_v31  ;;  %v1984_v30 = vld [vmem:[%s2880_s0 + $0x70] sm:$0xff] }
  0x16   :  { %v1989_v31 = vld [vmem:[%s2880_s0 + $0x30] sm:$0xff] }
  0x19   :  { %209 = vadd.xlane.f32.xlu1 %v208_v36  ;;  %206 = vadd.xlane.f32.xlu0 %v205_v37  ;;  %v60_v36 = vmul.f32 %v1984_v30, %v1984_v30  ;;  %v52_v37 = vmul.f32 %v1989_v31, %v1989_v31 }
  0x1d   :  { %215 = vadd.xlane.f32.xlu1 %v214_v42  ;;  %212 = vadd.xlane.f32.xlu0 %v211_v43  ;;  %v105_v42 = vsel %vm62_vm0, %v60_v36, 0.0  ;;  %v81_v43 = vsel %vm62_vm0, %v52_v37, 0.0  ;;  %v361_v36 = vsel %vm62_vm0, %v331_v26, 0.0  ;;  %v358_v37 = vsel %vm62_vm0, %v330_v27, 0.0 }
  0x21   :  { %221 = vadd.xlane.f32.xlu1 %v220_v48  ;;  %218 = vadd.xlane.f32.xlu0 %v217_v49  ;;  %v2016_v48 = vld [vmem:[%s2881_s1 + $0x8] sm:$0xff]  ;;  %v2021_v49 = vld [vmem:[%s2881_s1] sm:$0xff] }
  0x25   :  { %67 = vadd.xlane.f32.xlu1 %v66_v54  ;;  %64 = vadd.xlane.f32.xlu0 %v63_v55  ;;  %v325_v54 = vmul.f32 %v2016_v48, %v2016_v48  ;;  %v324_v55 = vmul.f32 %v2021_v49, %v2021_v49 }
  0x29   :  { %91 = vadd.xlane.f32.xlu1 %v90_v60  ;;  %88 = vadd.xlane.f32.xlu0 %v87_v61  ;;  %v343_v60 = vsel %vm62_vm0, %v325_v54, 0.0  ;;  %v340_v61 = vsel %vm62_vm0, %v324_v55, 0.0  ;;  %v2105_v54 = vld [vmem:[%s2881_s1 + $0x58] sm:$0xff] }
  0x2d   :  { %94 = vadd.xlane.f32.xlu1 %v93_v5  ;;  %70 = vadd.xlane.f32.xlu0 %v69_v7  ;;  %v2048_v5 = vld [vmem:[%s2881_s1 + $0x28] sm:$0xff]  ;;  %v2053_v7 = vld [vmem:[%s2881_s1 + $0x20] sm:$0xff] }
  0x31   :  { %97 = vadd.xlane.f32.xlu1 %v96_v14  ;;  %73 = vadd.xlane.f32.xlu0 %v72_v15  ;;  %v329_v14 = vmul.f32 %v2048_v5, %v2048_v5  ;;  %v328_v15 = vmul.f32 %v2053_v7, %v2053_v7 }
  0x35   :  { %100 = vadd.xlane.f32.xlu1 %v99_v24  ;;  %76 = vadd.xlane.f32.xlu0 %v75_v25  ;;  %v355_v24 = vsel %vm62_vm0, %v329_v14, 0.0  ;;  %v352_v25 = vsel %vm62_vm0, %v328_v15, 0.0 }
  0x39   :  { %103 = vadd.xlane.f32.xlu1 %v102_v32  ;;  %79 = vadd.xlane.f32.xlu0 %v78_v33  ;;  %v2080_v32 = vld [vmem:[%s2881_s1 + $0x48] sm:$0xff]  ;;  %v2085_v33 = vld [vmem:[%s2881_s1 + $0x40] sm:$0xff] }
  0x3d   :  { %106 = vadd.xlane.f32.xlu1 %v105_v42  ;;  %82 = vadd.xlane.f32.xlu0 %v81_v43  ;;  %v333_v42 = vmul.f32 %v2080_v32, %v2080_v32  ;;  %v332_v43 = vmul.f32 %v2085_v33, %v2085_v33 }
  0x3f   :  { %v367_v45 = vsel %vm62_vm0, %v333_v42, 0.0 }
  0x41   :  { %109 = vadd.xlane.f32.xlu1 %v108_v50  ;;  %85 = vadd.xlane.f32.xlu0 %v84_v51  ;;  %v364_v50 = vsel %vm62_vm0, %v332_v43, 0.0  ;;  %v334_v51 = vmul.f32 %v2096_v44, %v2096_v44 }
  0x43   :  { %v370_v55 = vsel %vm62_vm0, %v334_v51, 0.0 }
  0x45   :  { %344 = vadd.xlane.f32.xlu1 %v343_v60  ;;  %341 = vadd.xlane.f32.xlu0 %v340_v61  ;;  %v335_v60 = vmul.f32 %v2105_v54, %v2105_v54  ;;  %v320_v61 = vld [vmem:[%s2881_s1 + $0x60] sm:$0xff] }
  0x46   :  { %v336_v63 = vmul.f32 %v320_v61, %v320_v61 }
  0x47   :  { %v373_v62 = vsel %vm62_vm0, %v335_v60, 0.0 }
  0x49   :  { %350 = vadd.xlane.f32.xlu1 %v349_v10  ;;  %347 = vadd.xlane.f32.xlu0 %v346_v11  ;;  %v376_v10 = vsel %vm62_vm0, %v336_v63, 0.0 }
  0x4d   :  { %356 = vadd.xlane.f32.xlu1 %v355_v24  ;;  %353 = vadd.xlane.f32.xlu0 %v352_v25 }
  0x51   :  { %362 = vadd.xlane.f32.xlu1 %v361_v36  ;;  %359 = vadd.xlane.f32.xlu0 %v358_v37 }
  0x55   :  { %368 = vadd.xlane.f32.xlu1 %v367_v45  ;;  %365 = vadd.xlane.f32.xlu0 %v364_v50 }
  0x59   :  { %371 = vadd.xlane.f32.xlu1 %v370_v55 }
  0x5d   :  { %374 = vadd.xlane.f32.xlu1 %v373_v62 }
  0x61   :  { %377 = vadd.xlane.f32.xlu1 %v376_v10 }
  0x92   :  { %v183_v11 = vpop.xlane.xlu1 %182  ;;  %v177_v14 = vpop.xlane.xlu0 %176 }
  0x93   :  { %v225_v15 = vmax.f32 %v183_v11, 1e-24  ;;  %v223_v24 = vmax.f32 %v177_v14, 1e-24 }
  0x95   :  { %1571 = vrsqrt.f32 %v225_v15 }
  0x96   :  { %v186_v25 = vpop.xlane.xlu1 %185  ;;  %v180_v26 = vpop.xlane.xlu0 %179  ;;  %1573 = vrsqrt.f32 %v223_v24 }
  0x97   :  { %v226_v27 = vmax.f32 %v186_v25, 1e-24  ;;  %v224_v36 = vmax.f32 %v180_v26, 1e-24 }
  0x99   :  { %1575 = vrsqrt.f32 %v226_v27 }
  0x9a   :  { %1577 = vrsqrt.f32 %v224_v36  ;;  %v192_v37 = vpop.xlane.xlu1 %191  ;;  %v189_v42 = vpop.xlane.xlu0 %188 }
  0x9b   :  { %v228_v43 = vmax.f32 %v192_v37, 1e-24  ;;  %v227_v45 = vmax.f32 %v189_v42, 1e-24 }
  0x9d   :  { %1579 = vrsqrt.f32 %v228_v43 }
  0x9e   :  { %1581 = vrsqrt.f32 %v227_v45  ;;  %v198_v50 = vpop.xlane.xlu1 %197  ;;  %v195_v51 = vpop.xlane.xlu0 %194 }
  0x9f   :  { %v1572_v55 = vpop.eup %1571  ;;  %v230_v60 = vmax.f32 %v198_v50, 1e-24  ;;  %v229_v62 = vmax.f32 %v195_v51, 1e-24 }
  0xa0   :  { %v1574_v61 = vpop.eup %1573  ;;  %v257_v14 = vmul.f32 %v1572_v55, %v1762_v0 }
  0xa1   :  { %1583 = vrsqrt.f32 %v230_v60  ;;  %v255_v25 = vmul.f32 %v1574_v61, %v1767_v1 }
  0xa2   :  { %v204_v63 = vpop.xlane.xlu1 %203  ;;  %v201_v10 = vpop.xlane.xlu0 %200  ;;  %1585 = vrsqrt.f32 %v229_v62 }
  0xa3   :  { %v1576_v11 = vpop.eup %1575  ;;  %v232_v50 = vmax.f32 %v204_v63, 1e-24  ;;  %v231_v1 = vmax.f32 %v201_v10, 1e-24 }
  0xa4   :  { %v1578_v15 = vpop.eup %1577  ;;  %v258_v24 = vmul.f32 %v1576_v11, %v1772_v2 }
  0xa5   :  { %v256_v26 = vmul.f32 %v1578_v15, %v1783_v6  ;;  %1587 = vrsqrt.f32 %v232_v50 }
  0xa6   :  { %v210_v27 = vpop.xlane.xlu1 %209  ;;  %v207_v36 = vpop.xlane.xlu0 %206  ;;  %v1508_v0 = vpack.c.bf16 %v258_v24, %v257_v14  ;;  %1589 = vrsqrt.f32 %v231_v1 }
  0xa7   :  { %v1580_v42 = vpop.eup %1579  ;;  %v1502_v43 = vpack.c.bf16 %v256_v26, %v255_v25  ;;  %v234_v11 = vmax.f32 %v210_v27, 1e-24  ;;  %v233_v14 = vmax.f32 %v207_v36, 1e-24 }
  0xa8   :  { %v1582_v45 = vpop.eup %1581  ;;  %v260_v55 = vmul.f32 %v1580_v42, %v1790_v8 }
  0xa9   :  { %1504 = vmatprep.subr.msk.bf16.mxu0 %vm2121_vm1, %v1502_v43  ;;  %1550 = vmatprep.subr.msk.bf16.mxu1 %vm2121_vm1, %v1502_v43  ;;  %v259_v51 = vmul.f32 %v1582_v45, %v1795_v9  ;;  %1591 = vrsqrt.f32 %v234_v11 }
  0xaa   :  { %1507 = vmatpush3.bf16.xpose.msk.msra.mxu0 %vm2121_vm1, %v1502_v43  ;;  %1558 = vmatpush3.bf16.xpose.msk.msra.mxu1 %vm2121_vm1, %v1502_v43  ;;  %v216_v2 = vpop.xlane.xlu1 %215  ;;  %v213_v6 = vpop.xlane.xlu0 %212  ;;  %1593 = vrsqrt.f32 %v233_v14 }
  0xab   :  { %1510 = vmatprep.subr.msk.bf16.mxu0 %vm2121_vm1, %v1508_v0  ;;  %1551 = vmatprep.subr.msk.bf16.mxu1 %vm2121_vm1, %v1508_v0  ;;  %v1584_v62 = vpop.eup %1583  ;;  %v1514_v63 = vpack.c.bf16 %v260_v55, %v259_v51  ;;  %v236_v45 = vmax.f32 %v216_v2, 1e-24  ;;  %v235_v50 = vmax.f32 %v213_v6, 1e-24 }
  0xac   :  { %v1586_v10 = vpop.eup %1585  ;;  %v262_v25 = vmul.f32 %v1584_v62, %v1808_v16 }
  0xad   :  { %v261_v8 = vmul.f32 %v1586_v10, %v1813_v17 }
  0xae   :  { %v222_v60 = vpop.xlane.xlu1 %221  ;;  %v219_v61 = vpop.xlane.xlu0 %218 }
  0xaf   :  { %v1588_v36 = vpop.eup %1587  ;;  %v1520_v43 = vpack.c.bf16 %v262_v25, %v261_v8  ;;  %v238_v11 = vmax.f32 %v222_v60, 1e-24  ;;  %v237_v14 = vmax.f32 %v219_v61, 1e-24 }
  0xb0   :  { %v264_v2 = vmul.f32 %v1588_v36, %v1824_v22 }
  0xb2   :  { %1513 = vmatpush3.bf16.xpose.msk.msra.mxu0 %vm2121_vm1, %v1508_v0  ;;  %1559 = vmatpush3.bf16.xpose.msk.msra.mxu1 %vm2121_vm1, %v1508_v0  ;;  %v2143_v15 = vpop.xlane.xlu1 %67  ;;  %v65_v9 = vpop.xlane.xlu0 %64 }
  0xb3   :  { %v111_v24 = vmax.f32 %v65_v9, 1e-24  ;;  %1516 = vmatprep.subr.msk.bf16.mxu0 %vm2121_vm1, %v1514_v63  ;;  %1552 = vmatprep.subr.msk.bf16.mxu1 %vm2121_vm1, %v1514_v63  ;;  %v1590_v0 = vpop.eup %1589 }
  0xb4   :  { %v263_v1 = vmul.f32 %v1590_v0, %v1829_v23  ;;  %v1592_v6 = vpop.eup %1591 }
  0xb5   :  { %1595 = vrsqrt.f32 %v111_v24  ;;  %v1594_v62 = vpop.eup %1593  ;;  %v266_v61 = vmul.f32 %v1592_v6, %v1840_v28  ;;  %v112_v28 = vmax.f32 %v2143_v15, 1e-24 }
  0xb6   :  { %v2151_v26 = vpop.xlane.xlu1 %91  ;;  %v89_v27 = vpop.xlane.xlu0 %88  ;;  %v1526_v10 = vpack.c.bf16 %v264_v2, %v263_v1  ;;  %v265_v60 = vmul.f32 %v1594_v62, %v1845_v29 }
  0xb7   :  { %v119_v42 = vmax.f32 %v89_v27, 1e-24 }
  0xb8   :  { %v1532_v36 = vpack.c.bf16 %v266_v61, %v265_v60 }
  0xb9   :  { %1597 = vrsqrt.f32 %v119_v42 }
  0xba   :  { %1519 = vmatpush3.bf16.xpose.msk.msra.mxu0 %vm2121_vm1, %v1514_v63  ;;  %1560 = vmatpush3.bf16.xpose.msk.msra.mxu1 %vm2121_vm1, %v1514_v63  ;;  %v95_v16 = vpop.xlane.xlu1 %94  ;;  %v71_v17 = vpop.xlane.xlu0 %70  ;;  %1599 = vrsqrt.f32 %v236_v45 }
  0xbb   :  { %1522 = vmatprep.subr.msk.bf16.mxu0 %vm2121_vm1, %v1520_v43  ;;  %1553 = vmatprep.subr.msk.bf16.mxu1 %vm2121_vm1, %v1520_v43  ;;  %1601 = vrsqrt.f32 %v235_v50  ;;  %v121_v45 = vmax.f32 %v95_v16, 1e-24  ;;  %v113_v50 = vmax.f32 %v71_v17, 1e-24 }
  0xbc   :  { %1603 = vrsqrt.f32 %v238_v11 }
  0xbd   :  { %1605 = vrsqrt.f32 %v237_v14 }
  0xbe   :  { %v98_v51 = vpop.xlane.xlu1 %97  ;;  %v74_v55 = vpop.xlane.xlu0 %73  ;;  %1607 = vrsqrt.f32 %v112_v28 }
  0xbf   :  { %v1596_v63 = vpop.eup %1595  ;;  %v122_v2 = vmax.f32 %v98_v51, 1e-24 }
  0xc0   :  { %v2164_v9 = vmul.f32 %v1596_v63, %v1893_v47 }
  0xc2   :  { %1525 = vmatpush3.bf16.xpose.msk.msra.mxu0 %vm2121_vm1, %v1520_v43  ;;  %1561 = vmatpush3.bf16.xpose.msk.msra.mxu1 %vm2121_vm1, %v1520_v43  ;;  %v101_v22 = vpop.xlane.xlu1 %100  ;;  %v77_v23 = vpop.xlane.xlu0 %76  ;;  %v120_v43 = vmax.f32 %v2151_v26, 1e-24  ;;  %v114_v26 = vmax.f32 %v74_v55, 1e-24 }
  0xc3   :  { %1528 = vmatprep.subr.msk.bf16.mxu0 %vm2121_vm1, %v1526_v10  ;;  %1554 = vmatprep.subr.msk.bf16.mxu1 %vm2121_vm1, %v1526_v10  ;;  %v1598_v47 = vpop.eup %1597  ;;  %v123_v11 = vmax.f32 %v101_v22, 1e-24  ;;  %v115_v51 = vmax.f32 %v77_v23, 1e-24 }
  0xc4   :  { %1478 = vmatprep.mubr.msk.f32.mxu0 %vm62_vm0, %v2164_v9  ;;  %v2179_v24 = vmul.f32 %v1598_v47, %v1909_v53  ;;  %v1600_v27 = vpop.eup %1599  ;;  %1609 = vrsqrt.f32 %v120_v43 }
  0xc5   :  { %v1602_v29 = vpop.eup %1601  ;;  %v268_v0 = vmul.f32 %v1600_v27, %v1856_v34  ;;  %1611 = vrsqrt.f32 %v121_v45 }
  0xc6   :  { %v104_v8 = vpop.xlane.xlu1 %103  ;;  %v2181_v25 = vpop.xlane.xlu0 %79  ;;  %1490 = vmatprep.mubr.msk.f32.mxu1 %vm62_vm0, %v2179_v24  ;;  %v267_v15 = vmul.f32 %v1602_v29, %v1861_v35  ;;  %1613 = vrsqrt.f32 %v113_v50 }
  0xc7   :  { %v1604_v1 = vpop.eup %1603  ;;  %1615 = vrsqrt.f32 %v122_v2  ;;  %v124_v22 = vmax.f32 %v104_v8, 1e-24 }
  0xc8   :  { %v1538_v63 = vpack.c.bf16 %v268_v0, %v267_v15  ;;  %v270_v17 = vmul.f32 %v1604_v1, %v1872_v40  ;;  %1617 = vrsqrt.f32 %v114_v26  ;;  %v116_v40 = vmax.f32 %v2181_v25, 1e-24 }
  0xc9   :  { %1619 = vrsqrt.f32 %v123_v11 }
  0xca   :  { %1531 = vmatpush3.bf16.xpose.msk.msra.mxu0 %vm2121_vm1, %v1526_v10  ;;  %1562 = vmatpush3.bf16.xpose.msk.msra.mxu1 %vm2121_vm1, %v1526_v10  ;;  %v2190_v42 = vpop.xlane.xlu1 %106  ;;  %v2192_v53 = vpop.xlane.xlu0 %82 }
  0xcb   :  { %1534 = vmatprep.subr.msk.bf16.mxu0 %vm2121_vm1, %v1532_v36  ;;  %1555 = vmatprep.subr.msk.bf16.mxu1 %vm2121_vm1, %v1532_v36  ;;  %v1606_v10 = vpop.eup %1605  ;;  %v117_v50 = vmax.f32 %v2192_v53, 1e-24 }
  0xcc   :  { %v269_v16 = vmul.f32 %v1606_v10, %v1877_v41  ;;  %v1608_v27 = vpop.eup %1607 }
  0xce   :  { %v2201_v6 = vpop.xlane.xlu1 %109  ;;  %v86_v62 = vpop.xlane.xlu0 %85  ;;  %v1544_v47 = vpack.c.bf16 %v270_v17, %v269_v16 }
  0xcf   :  { %v1610_v29 = vpop.eup %1609  ;;  %v118_v25 = vmax.f32 %v86_v62, 1e-24  ;;  %v144_v62 = vmul.f32 %v1608_v27, %v1888_v46  ;;  %v126_v16 = vmax.f32 %v2201_v6, 1e-24 }
  0xd0   :  { %v1612_v28 = vpop.eup %1611 }
  0xd1   :  { %v1614_v15 = vpop.eup %1613 }
  0xd2   :  { %1537 = vmatpush3.bf16.xpose.msk.msra.mxu0 %vm2121_vm1, %v1532_v36  ;;  %1563 = vmatpush3.bf16.xpose.msk.msra.mxu1 %vm2121_vm1, %v1532_v36  ;;  %v345_v34 = vpop.xlane.xlu1 %344  ;;  %v342_v35 = vpop.xlane.xlu0 %341  ;;  %v125_v36 = vmax.f32 %v2190_v42, 1e-24 }
  0xd3   :  { %v389_v55 = vmax.f32 %v345_v34, 1e-24  ;;  %v388_v14 = vmax.f32 %v342_v35, 1e-24  ;;  %1540 = vmatprep.subr.msk.bf16.mxu0 %vm2121_vm1, %v1538_v63  ;;  %1556 = vmatprep.subr.msk.bf16.mxu1 %vm2121_vm1, %v1538_v63  ;;  %v1616_v42 = vpop.eup %1615 }
  0xd4   :  { %v1618_v1 = vpop.eup %1617 }
  0xd5   :  { %1621 = vrsqrt.f32 %v389_v55  ;;  %v1620_v2 = vpop.eup %1619 }
  0xd6   :  { %1623 = vrsqrt.f32 %v388_v14  ;;  %v351_v60 = vpop.xlane.xlu1 %350  ;;  %v348_v61 = vpop.xlane.xlu0 %347 }
  0xd7   :  { %1625 = vrsqrt.f32 %v115_v51  ;;  %v391_v41 = vmax.f32 %v351_v60, 1e-24  ;;  %v390_v23 = vmax.f32 %v348_v61, 1e-24 }
  0xd8   :  { %1627 = vrsqrt.f32 %v124_v22  ;;  %v146_v22 = vmul.f32 %v1618_v1, %v1941_v4 }
  0xd9   :  { %1629 = vrsqrt.f32 %v391_v41 }
  0xda   :  { %1631 = vrsqrt.f32 %v390_v23  ;;  %1543 = vmatpush3.bf16.xpose.msk.msra.mxu0 %vm2121_vm1, %v1538_v63  ;;  %1564 = vmatpush3.bf16.xpose.msk.msra.mxu1 %vm2121_vm1, %v1538_v63  ;;  %v357_v8 = vpop.xlane.xlu1 %356  ;;  %v354_v43 = vpop.xlane.xlu0 %353 }
  0xdb   :  { %1633 = vrsqrt.f32 %v116_v40  ;;  %v393_v0 = vmax.f32 %v357_v8, 1e-24  ;;  %v392_v45 = vmax.f32 %v354_v43, 1e-24  ;;  %1546 = vmatprep.subr.msk.bf16.mxu0 %vm2121_vm1, %v1544_v47  ;;  %1557 = vmatprep.subr.msk.bf16.mxu1 %vm2121_vm1, %v1544_v47  ;;  %v145_v40 = vmul.f32 %v1614_v15, %v1925_v59 }
  0xdc   :  { %1635 = vrsqrt.f32 %v125_v36  ;;  %v153_v8 = vmul.f32 %v1612_v28, %v1920_v58 }
  0xdd   :  { %1637 = vrsqrt.f32 %v393_v0 }
  0xde   :  { %1639 = vrsqrt.f32 %v392_v45  ;;  %v363_v10 = vpop.xlane.xlu1 %362  ;;  %v360_v26 = vpop.xlane.xlu0 %359 }
  0xdf   :  { %v1622_v63 = vpop.eup %1621  ;;  %1641 = vrsqrt.f32 %v118_v25  ;;  %v395_v11 = vmax.f32 %v363_v10, 1e-24  ;;  %v394_v34 = vmax.f32 %v360_v26, 1e-24 }
  0xe0   :  { %v1624_v35 = vpop.eup %1623  ;;  %1643 = vrsqrt.f32 %v117_v50  ;;  %v421_v17 = vmul.f32 %v1622_v63, %v2016_v48 }
  0xe1   :  { %v1626_v51 = vpop.eup %1625  ;;  %1645 = vrsqrt.f32 %v395_v11  ;;  %v420_v53 = vmul.f32 %v1624_v35, %v2021_v49 }
  0xe2   :  { %v1628_v55 = vpop.eup %1627  ;;  %1647 = vrsqrt.f32 %v394_v34  ;;  %1549 = vmatpush3.bf16.xpose.msk.msra.mxu0 %vm2121_vm1, %v1544_v47  ;;  %1565 = vmatpush3.bf16.xpose.msk.msra.mxu1 %vm2121_vm1, %v1544_v47  ;;  %v369_v46 = vpop.xlane.xlu1 %368  ;;  %v2233_v60 = vmul.f32 %v421_v17, %v144_v62  ;;  %v152_v47 = vmul.f32 %v1610_v29, %v1904_v52  ;;  %v154_v52 = vmul.f32 %v1616_v42, %v1936_v3 }
  0xe3   :  { %v366_v14 = vpop.xlane.xlu0 %365  ;;  %v1630_v6 = vpop.eup %1629  ;;  %v397_v48 = vmax.f32 %v369_v46, 1e-24  ;;  %v2237_v49 = vmul.f32 %v420_v53, %v2164_v9  ;;  %1649 = vrsqrt.f32 %v126_v16  ;;  %v147_v58 = vmul.f32 %v1626_v51, %v1957_v13 }
  0xe4   :  { %v396_v61 = vmax.f32 %v366_v14, 1e-24  ;;  %v1632_v41 = vpop.eup %1631  ;;  %v423_v23 = vmul.f32 %v1630_v6, %v2032_v56  ;;  %v2268_v42 = vmul.f32 %v1628_v55, %v1968_v20  ;;  %v1736_v51 = vmov -1e+30  }
  0xe5   :  { %v1634_v37 = vpop.eup %1633  ;;  %1651 = vrsqrt.f32 %v397_v48  ;;  %v422_v4 = vmul.f32 %v1632_v41, %v2037_v57  ;;  %277 = vst.msk [vmem:[#allocation2 + $0x8] sm:$0xff] %vm275_vm2, %v1736_v51  ;;  %276 = vst.msk [vmem:[#allocation2] sm:$0xff] %vm275_vm2, %v1736_v51 }
  0xe6   :  { %v1636_v27 = vpop.eup %1635  ;;  %1653 = vrsqrt.f32 %v396_v61  ;;  %v372_v36 = vpop.xlane.xlu1 %371  ;;  %v2243_v43 = vmul.f32 %v423_v23, %v146_v22  ;;  %v148_v56 = vmul.f32 %v1634_v37, %v1973_v21  ;;  %v2257_v21 = vmul.f32 %v1620_v2, %v1952_v12  ;;  %278 = vst.msk [vmem:[#allocation2 + $0x10] sm:$0xff] %vm275_vm2, %v1736_v51  ;;  %279 = vst.msk [vmem:[#allocation2 + $0x18] sm:$0xff] %vm275_vm2, %v1736_v51 }
  0xe7   :  { %v1638_v59 = vpop.eup %1637  ;;  %v398_v9 = vmax.f32 %v372_v36, 1e-24  ;;  %v2245_v15 = vmul.f32 %v422_v4, %v145_v40  ;;  %280 = vst.msk [vmem:[#allocation2 + $0x20] sm:$0xff] %vm275_vm2, %v1736_v51  ;;  %281 = vst.msk [vmem:[#allocation2 + $0x28] sm:$0xff] %vm275_vm2, %v1736_v51 }
  0xe8   :  { %v1640_v25 = vpop.eup %1639  ;;  %v425_v0 = vmul.f32 %v1638_v59, %v2048_v5  ;;  %282 = vst.msk [vmem:[#allocation2 + $0x30] sm:$0xff] %vm275_vm2, %v1736_v51  ;;  %283 = vst.msk [vmem:[#allocation2 + $0x38] sm:$0xff] %vm275_vm2, %v1736_v51 }
  0xe9   :  { %v1642_v45 = vpop.eup %1641  ;;  %1655 = vrsqrt.f32 %v398_v9  ;;  %1479 = vmatmul.mubr.msk.f32.vlgmr.msra.gmra.mrb[0].mxu0 %vm62_vm0, %v144_v62  ;;  %1491 = vmatmul.mubr.msk.f32.vlgmr.msra.gmra.mrb[0].mxu1 %vm62_vm0, %v152_v47  ;;  %v424_v57 = vmul.f32 %v1640_v25, %v2053_v7  ;;  %284 = vst.msk [vmem:[#allocation2 + $0x40] sm:$0xff] %vm275_vm2, %v1736_v51  ;;  %285 = vst.msk [vmem:[#allocation2 + $0x48] sm:$0xff] %vm275_vm2, %v1736_v51 }
  0xea   :  { %v1644_v29 = vpop.eup %1643  ;;  %v375_v28 = vpop.xlane.xlu1 %374  ;;  %1481 = vmatprep.mubr.msk.f32.mxu0 %vm62_vm0, %v145_v40  ;;  %1493 = vmatprep.mubr.msk.f32.mxu1 %vm62_vm0, %v153_v8  ;;  %v2259_v5 = vmul.f32 %v425_v0, %v148_v56  ;;  %v150_v13 = vmul.f32 %v1642_v45, %v2005_v39  ;;  %v2276_v39 = vmul.f32 %v1636_v27, %v1984_v30 }
  0xeb   :  { %v1646_v50 = vpop.eup %1645  ;;  %v399_v1 = vmax.f32 %v375_v28, 1e-24  ;;  %v2261_v10 = vmul.f32 %v424_v57, %v147_v58  ;;  %v149_v12 = vmul.f32 %v1644_v29, %v1989_v31  ;;  %286 = vst.msk [vmem:[#allocation2 + $0x50] sm:$0xff] %vm275_vm2, %v1736_v51  ;;  %287 = vst.msk [vmem:[#allocation2 + $0x58] sm:$0xff] %vm275_vm2, %v1736_v51 }
  0xec   :  { %v1648_v3 = vpop.eup %1647  ;;  %v427_v7 = vmul.f32 %v1646_v50, %v2064_v18  ;;  %288 = vst.msk [vmem:[#allocation2 + $0x60] sm:$0xff] %vm275_vm2, %v1736_v51  ;;  %289 = vst.msk [vmem:[#allocation2 + $0x68] sm:$0xff] %vm275_vm2, %v1736_v51 }
  0xed   :  { %1657 = vrsqrt.f32 %v399_v1  ;;  %1482 = vmatmul.mubr.msk.f32.gmra.mrb[2].mxu0 %vm62_vm0, %v146_v22  ;;  %1494 = vmatmul.mubr.msk.f32.gmra.mrb[2].mxu1 %vm62_vm0, %v154_v52  ;;  %v426_v2 = vmul.f32 %v1648_v3, %v2069_v19  ;;  %v1650_v26 = vpop.eup %1649  ;;  %290 = vst.msk [vmem:[#allocation2 + $0x70] sm:$0xff] %vm275_vm2, %v1736_v51  ;;  %291 = vst.msk [vmem:[#allocation2 + $0x78] sm:$0xff] %vm275_vm2, %v1736_v51 }
  0xee   :  { %1484 = vmatprep.mubr.msk.f32.mxu0 %vm62_vm0, %v147_v58  ;;  %1496 = vmatprep.mubr.msk.f32.mxu1 %vm62_vm0, %v2257_v21  ;;  %v2278_v18 = vmul.f32 %v427_v7, %v150_v13  ;;  %v2287_v31 = vmul.f32 %v1650_v26, %v2000_v38 }
  0xef   :  { %v1652_v62 = vpop.eup %1651  ;;  %v2280_v63 = vmul.f32 %v426_v2, %v149_v12 }
  0xf0   :  { %v1654_v20 = vpop.eup %1653  ;;  %v429_v11 = vmul.f32 %v1652_v62, %v2080_v32 }
  0xf1   :  { %1485 = vmatmul.mubr.msk.f32.gmra.mrb[4].mxu0 %vm62_vm0, %v148_v56  ;;  %1497 = vmatmul.mubr.msk.f32.gmra.mrb[4].mxu1 %vm62_vm0, %v2268_v42  ;;  %v428_v19 = vmul.f32 %v1654_v20, %v2085_v33 }
  0xf2   :  { %1487 = vmatprep.mubr.msk.f32.mxu0 %vm62_vm0, %v149_v12  ;;  %1499 = vmatprep.mubr.msk.f32.mxu1 %vm62_vm0, %v2276_v39  ;;  %v2293_v30 = vmul.f32 %v429_v11, %v152_v47 }
  0xf3   :  { %v1656_v34 = vpop.eup %1655  ;;  %v2296_v32 = vmul.f32 %v428_v19, %v2179_v24 }
  0xf4   :  { %v430_v35 = vmul.f32 %v1656_v34, %v2096_v44  ;;  %v2883_v44 = vmov 0.0  }
  0xf5   :  { %1488 = vmatmul.mubr.msk.f32.gmra.mrb[6].mxu0 %vm62_vm0, %v150_v13  ;;  %1500 = vmatmul.mubr.msk.f32.gmra.mrb[6].mxu1 %vm62_vm0, %v2287_v31  ;;  %292 = vst.msk [vmem:[#allocation3] sm:$0xff] %vm275_vm2, %v2883_v44  ;;  %293 = vst.msk [vmem:[#allocation3 + $0x8] sm:$0xff] %vm275_vm2, %v2883_v44 }
  0xf6   :  { %v2302_v38 = vmul.f32 %v430_v35, %v153_v8  ;;  %294 = vst.msk [vmem:[#allocation3 + $0x10] sm:$0xff] %vm275_vm2, %v2883_v44  ;;  %295 = vst.msk [vmem:[#allocation3 + $0x18] sm:$0xff] %vm275_vm2, %v2883_v44 }
  0xf7   :  { %v1658_v33 = vpop.eup %1657  ;;  %296 = vst.msk [vmem:[#allocation3 + $0x20] sm:$0xff] %vm275_vm2, %v2883_v44  ;;  %297 = vst.msk [vmem:[#allocation3 + $0x28] sm:$0xff] %vm275_vm2, %v2883_v44 }
  0xf8   :  { %v431_v16 = vmul.f32 %v1658_v33, %v2105_v54  ;;  %298 = vst.msk [vmem:[#allocation3 + $0x30] sm:$0xff] %vm275_vm2, %v2883_v44  ;;  %299 = vst.msk [vmem:[#allocation3 + $0x38] sm:$0xff] %vm275_vm2, %v2883_v44  ;;  %v758_v54 = vlaneseq }
  0xf9   :  { %300 = vst.msk [vmem:[#allocation3 + $0x40] sm:$0xff] %vm275_vm2, %v2883_v44  ;;  %301 = vst.msk [vmem:[#allocation3 + $0x48] sm:$0xff] %vm275_vm2, %v2883_v44 }
  0xfa   :  { %v2305_v17 = vmul.f32 %v431_v16, %v154_v52  ;;  %302 = vst.msk [vmem:[#allocation3 + $0x50] sm:$0xff] %vm275_vm2, %v2883_v44  ;;  %303 = vst.msk [vmem:[#allocation3 + $0x58] sm:$0xff] %vm275_vm2, %v2883_v44  ;;  %v2355_v24 = vshrl.u32 %v758_v54, 7  ;;  %v2358_v55 = vand.u32 127, %v758_v54 }
  0xfb   :  { %304 = vst.msk [vmem:[#allocation3 + $0x60] sm:$0xff] %vm275_vm2, %v2883_v44  ;;  %305 = vst.msk [vmem:[#allocation3 + $0x68] sm:$0xff] %vm275_vm2, %v2883_v44 }
  0xfc   :  { %306 = vst.msk [vmem:[#allocation3 + $0x70] sm:$0xff] %vm275_vm2, %v2883_v44  ;;  %307 = vst.msk [vmem:[#allocation3 + $0x78] sm:$0xff] %vm275_vm2, %v2883_v44  ;;  %v760_v53 = vadd.s32 8, %v2355_v24  ;;  %v768_v46 = vadd.s32 72, %v2355_v24  ;;  %v767_v14 = vadd.s32 64, %v2355_v24  ;;  %vm813_vm4 = vcmp.ge.s32.totalorder %v2358_v55, 16 }
  0xfd   :  { %vm797_vm5 = vcmp.eq.s32.totalorder %v2355_v24, %v2358_v55  ;;  %v762_v22 = vadd.s32 24, %v2355_v24  ;;  %v761_v6 = vadd.s32 16, %v2355_v24  ;;  %v770_v61 = vadd.s32 88, %v2355_v24 }
  0xfe   :  { %vm798_vm3 = vcmp.eq.s32.totalorder %v760_v53, %v2358_v55  ;;  %vm806_vm6 = vcmp.eq.s32.totalorder %v768_v46, %v2358_v55  ;;  %vm805_vm8 = vcmp.eq.s32.totalorder %v767_v14, %v2358_v55  ;;  %vm814_vm9 = vmor %vm797_vm5, %vm813_vm4  ;;  %v769_v41 = vadd.s32 80, %v2355_v24 }
  0xff   :  { %vm815_vm7 = vmor %vm798_vm3, %vm813_vm4  ;;  %vm800_vm12 = vcmp.eq.s32.totalorder %v762_v22, %v2358_v55  ;;  %v830_v40 = vsel %vm814_vm9, 1e+09, %v2883_v44  ;;  %vm799_vm13 = vcmp.eq.s32.totalorder %v761_v6, %v2358_v55  ;;  %vm808_vm1 = vcmp.eq.s32.totalorder %v770_v61, %v2358_v55 }
 0x100   :  { %vm823_vm10 = vmor %vm806_vm6, %vm813_vm4  ;;  %v831_v48 = vsel %vm815_vm7, 1e+09, %v2883_v44  ;;  %v764_v9 = vadd.s32 40, %v2355_v24  ;;  %vm807_vm3 = vcmp.eq.s32.totalorder %v769_v41, %v2358_v55  ;;  %v763_v56 = vadd.s32 32, %v2355_v24 }
 0x101   :  { %vm822_vm11 = vmor %vm805_vm8, %vm813_vm4  ;;  %v839_v47 = vsel %vm823_vm10, 1e+09, %v2883_v44  ;;  %v772_v50 = vadd.s32 104, %v2355_v24  ;;  %v771_v3 = vadd.s32 96, %v2355_v24  ;;  %v766_v11 = vadd.s32 56, %v2355_v24 }
 0x102   :  { %v838_v8 = vsel %vm822_vm11, 1e+09, %v2883_v44  ;;  %vm817_vm14 = vmor %vm800_vm12, %vm813_vm4  ;;  %vm802_vm7 = vcmp.eq.s32.totalorder %v764_v9, %v2358_v55  ;;  %vm801_vm8 = vcmp.eq.s32.totalorder %v763_v56, %v2358_v55  ;;  %v765_v34 = vadd.s32 48, %v2355_v24  ;;  %v2483_v56 = vld [vmem:[%s2881_s1 + $0x68] sm:$0xff] }
 0x103   :  { %vm816_vm15 = vmor %vm799_vm13, %vm813_vm4  ;;  %v833_v52 = vsel %vm817_vm14, 1e+09, %v2883_v44  ;;  %vm810_vm11 = vcmp.eq.s32.totalorder %v772_v50, %v2358_v55  ;;  %vm809_vm12 = vcmp.eq.s32.totalorder %v771_v3, %v2358_v55  ;;  %v774_v14 = vadd.s32 120, %v2355_v24 }
 0x104   :  { %v832_v29 = vsel %vm816_vm15, 1e+09, %v2883_v44  ;;  %vm825_vm5 = vmor %vm808_vm1, %vm813_vm4  ;;  %vm804_vm15 = vcmp.eq.s32.totalorder %v766_v11, %v2358_v55  ;;  %vm803_vm1 = vcmp.eq.s32.totalorder %v765_v34, %v2358_v55  ;;  %v773_v6 = vadd.s32 112, %v2355_v24 }
 0x105   :  { %vm824_vm6 = vmor %vm807_vm3, %vm813_vm4  ;;  %v841_v7 = vsel %vm825_vm5, 1e+09, %v2883_v44  ;;  %v1738_v41 = vmov 0  }
 0x106   :  { %v840_v26 = vsel %vm824_vm6, 1e+09, %v2883_v44  ;;  %vm819_vm9 = vmor %vm802_vm7, %vm813_vm4  ;;  %vm812_vm6 = vcmp.eq.s32.totalorder %v774_v14, %v2358_v55  ;;  %1569 = vset.pattern.permute.xlu0 %v1738_v41  ;;  %1570 = vset.pattern.permute.xlu1 %v1738_v41  ;;  %vm811_vm7 = vcmp.eq.s32.totalorder %v773_v6, %v2358_v55  ;;  %v2551_v41 = vld [vmem:[#allocation2 + $0x10] sm:$0xff] }
 0x107   :  { %vm818_vm10 = vmor %vm801_vm8, %vm813_vm4  ;;  %v835_v33 = vsel %vm819_vm9, 1e+09, %v2883_v44 }
 0x108   :  { %v834_v54 = vsel %vm818_vm10, 1e+09, %v2883_v44  ;;  %vm827_vm13 = vmor %vm810_vm11, %vm813_vm4 }
 0x109   :  { %vm826_vm14 = vmor %vm809_vm12, %vm813_vm4  ;;  %v843_v61 = vsel %vm827_vm13, 1e+09, %v2883_v44 }
 0x10a   :  { %vm821_vm3 = vmor %vm804_vm15, %vm813_vm4 }
 0x10b   :  { %vm820_vm5 = vmor %vm803_vm1, %vm813_vm4 }
 0x10c   :  { %vm829_vm8 = vmor %vm812_vm6, %vm813_vm4 }
 0x10d   :  { %vm828_vm9 = vmor %vm811_vm7, %vm813_vm4 }
 0x10e   :  { %v844_v9 = vsel %vm828_vm9, 1e+09, %v2883_v44 }
 0x1bc   :  { %v1480_v23 = vpop.f32.mrb[0].mxu0  ;;  %v1492_v37 = vpop.f32.mrb[0].mxu1 }
 0x1bd   :  { %v2385_v4 = vsub.f32 %v1480_v23, %v831_v48  ;;  %v678_v27 = vpop.f32.mrb[1].mxu0  ;;  %v718_v36 = vpop.f32.mrb[1].mxu1  ;;  %v2397_v25 = vsub.f32 %v1492_v37, %v839_v47  ;;  %v837_v37 = vsel %vm821_vm3, 1e+09, %v2883_v44  ;;  %v836_v47 = vsel %vm820_vm5, 1e+09, %v2883_v44 }
 0x1be   :  { %v2390_v59 = vsub.f32 %v678_v27, %v830_v40  ;;  %v2402_v0 = vsub.f32 %v718_v36, %v838_v8  ;;  %v842_v40 = vsel %vm826_vm14, 1e+09, %v2883_v44  ;;  %v845_v8 = vsel %vm829_vm8, 1e+09, %v2883_v44  ;;  %v2623_v44 = vld [vmem:[#allocation2 + $0x38] sm:$0xff] }
 0x1bf   :  { %880 = vmax.xlane.f32.xlu1 %v2385_v4  ;;  %2905 = vst [vmem:[#allocation12_spill] sm:$0xff] %v2623_v44 }
 0x1c0   :  { %878 = vmax.xlane.f32.xlu0 %v2390_v59  ;;  %v1483_v45 = vpop.f32.mrb[2].mxu0  ;;  %v1495_v58 = vpop.f32.mrb[2].mxu1 }
 0x1c1   :  { %v688_v57 = vpop.f32.mrb[3].mxu0  ;;  %v728_v28 = vpop.f32.mrb[3].mxu1  ;;  %v2413_v1 = vsub.f32 %v1483_v45, %v833_v52  ;;  %v2428_v19 = vsub.f32 %v1495_v58, %v841_v7  ;;  %v337_v52 = vmul.f32 %v2483_v56, %v2483_v56  ;;  %v2496_v58 = vld [vmem:[%s2881_s1 + $0x70] sm:$0xff] }
 0x1c2   :  { %v2418_v13 = vsub.f32 %v688_v57, %v832_v29  ;;  %v2433_v35 = vsub.f32 %v728_v28, %v840_v26  ;;  %v338_v29 = vmul.f32 %v2496_v58, %v2496_v58  ;;  %v2506_v28 = vld [vmem:[%s2881_s1 + $0x78] sm:$0xff]  ;;  %v2516_v26 = vld [vmem:[#allocation2] sm:$0xff] }
 0x1c3   :  { %896 = vmax.xlane.f32.xlu1 %v2397_v25  ;;  %v379_v57 = vsel %vm62_vm0, %v337_v52, 0.0  ;;  %v339_v3 = vmul.f32 %v2506_v28, %v2506_v28 }
 0x1c4   :  { %894 = vmax.xlane.f32.xlu0 %v2402_v0  ;;  %v1486_v12 = vpop.f32.mrb[4].mxu0  ;;  %v1498_v2 = vpop.f32.mrb[4].mxu1  ;;  %v382_v50 = vsel %vm62_vm0, %v338_v29, 0.0 }
 0x1c5   :  { %v698_v62 = vpop.f32.mrb[5].mxu0  ;;  %v738_v20 = vpop.f32.mrb[5].mxu1  ;;  %v2445_v22 = vsub.f32 %v1486_v12, %v835_v33  ;;  %v2460_v24 = vsub.f32 %v1498_v2, %v843_v61  ;;  %v385_v7 = vsel %vm62_vm0, %v339_v3, 0.0  ;;  %v2514_v2 = vld [vmem:[#allocation2 + $0x8] sm:$0xff]  ;;  %v2544_v61 = vld [vmem:[#allocation2 + $0x18] sm:$0xff] }
 0x1c6   :  { %v2450_v48 = vsub.f32 %v698_v62, %v834_v54  ;;  %v2464_v23 = vsub.f32 %v738_v20, %v842_v40  ;;  %v2512_v12 = vpop.xlane.xlu1 %377  ;;  %v2524_v33 = vld [vmem:[#allocation2 + $0x48] sm:$0xff] }
 0x1c7   :  { %884 = vmax.xlane.f32.xlu1 %v2413_v1  ;;  %v2603_v54 = vld [vmem:[#allocation2 + $0x68] sm:$0xff] }
 0x1c8   :  { %882 = vmax.xlane.f32.xlu0 %v2418_v13  ;;  %v1489_v16 = vpop.f32.mrb[6].mxu0  ;;  %v1501_v51 = vpop.f32.mrb[6].mxu1  ;;  %2902 = vst [vmem:[#allocation9_spill] sm:$0xff] %v2603_v54 }
 0x1c9   :  { %v708_v53 = vpop.f32.mrb[7].mxu0  ;;  %v748_v46 = vpop.f32.mrb[7].mxu1  ;;  %v2473_v27 = vsub.f32 %v1489_v16, %v837_v37  ;;  %v2486_v55 = vsub.f32 %v1501_v51, %v845_v8  ;;  %v2531_v51 = vld [vmem:[#allocation2 + $0x40] sm:$0xff] }
 0x1ca   :  { %v2476_v36 = vsub.f32 %v708_v53, %v836_v47  ;;  %v2489_v45 = vsub.f32 %v748_v46, %v844_v9 }
 0x1cb   :  { %900 = vmax.xlane.f32.xlu1 %v2428_v19 }
 0x1cc   :  { %898 = vmax.xlane.f32.xlu0 %v2433_v35 }
 0x1cf   :  { %888 = vmax.xlane.f32.xlu1 %v2445_v22 }
 0x1d0   :  { %886 = vmax.xlane.f32.xlu0 %v2450_v48 }
 0x1d3   :  { %904 = vmax.xlane.f32.xlu1 %v2460_v24 }
 0x1d4   :  { %902 = vmax.xlane.f32.xlu0 %v2464_v23 }
 0x1d7   :  { %892 = vmax.xlane.f32.xlu1 %v2473_v27 }
 0x1d8   :  { %890 = vmax.xlane.f32.xlu0 %v2476_v36 }
 0x1db   :  { %908 = vmax.xlane.f32.xlu1 %v2486_v55 }
 0x1dc   :  { %906 = vmax.xlane.f32.xlu0 %v2489_v45 }
 0x1df   :  { %380 = vadd.xlane.f32.xlu1 %v379_v57  ;;  %v2564_v57 = vld [vmem:[#allocation2 + $0x58] sm:$0xff] }
 0x1e3   :  { %383 = vadd.xlane.f32.xlu1 %v382_v50  ;;  %v2570_v50 = vld [vmem:[#allocation2 + $0x50] sm:$0xff] }
 0x1e7   :  { %386 = vadd.xlane.f32.xlu1 %v385_v7 }
 0x24c   :  { %v881_v62 = vpop.xlane.xlu1 %880 }
 0x24d   :  { %v2519_v20 = vmax.f32 %v2514_v2, %v881_v62  ;;  %v879_v11 = vpop.xlane.xlu0 %878 }
 0x24e   :  { %v2522_v34 = vmax.f32 %v2516_v26, %v879_v11 }
 0x24f   :  { %1200 = vst.msk [vmem:[#allocation2 + $0x8] sm:$0xff] %vm275_vm2, %v2519_v20  ;;  %1013 = vperm.xlu0 %1569, %v2519_v20  }
 0x250   :  { %1199 = vst.msk [vmem:[#allocation2] sm:$0xff] %vm275_vm2, %v2522_v34  ;;  %v897_v53 = vpop.xlane.xlu1 %896  ;;  %1008 = vperm.xlu1 %1570, %v2522_v34  }
 0x251   :  { %v2539_v46 = vmax.f32 %v2524_v33, %v897_v53  ;;  %v895_v14 = vpop.xlane.xlu0 %894 }
 0x252   :  { %v2542_v6 = vmax.f32 %v2531_v51, %v895_v14  ;;  %v2583_v14 = vld [vmem:[#allocation2 + $0x28] sm:$0xff] }
 0x253   :  { %1208 = vst.msk [vmem:[#allocation2 + $0x48] sm:$0xff] %vm275_vm2, %v2539_v46  ;;  %1053 = vperm.xlu0 %1569, %v2539_v46   ;;  %2898 = vst [vmem:[#allocation5_spill] sm:$0xff] %v2583_v14 }
 0x254   :  { %1207 = vst.msk [vmem:[#allocation2 + $0x40] sm:$0xff] %vm275_vm2, %v2542_v6  ;;  %v885_v47 = vpop.xlane.xlu1 %884  ;;  %1048 = vperm.xlu1 %1570, %v2542_v6  }
 0x255   :  { %v2559_v8 = vmax.f32 %v2544_v61, %v885_v47  ;;  %v883_v9 = vpop.xlane.xlu0 %882 }
 0x256   :  { %v2562_v52 = vmax.f32 %v2551_v41, %v883_v9  ;;  %v2590_v9 = vld [vmem:[#allocation2 + $0x20] sm:$0xff] }
 0x257   :  { %1202 = vst.msk [vmem:[#allocation2 + $0x18] sm:$0xff] %vm275_vm2, %v2559_v8  ;;  %2899 = vst [vmem:[#allocation6_spill] sm:$0xff] %v2590_v9 }
 0x258   :  { %1201 = vst.msk [vmem:[#allocation2 + $0x10] sm:$0xff] %vm275_vm2, %v2562_v52  ;;  %v901_v7 = vpop.xlane.xlu1 %900  ;;  %1023 = vperm.xlu1 %1570, %v2559_v8  }
 0x259   :  { %v2578_v62 = vmax.f32 %v2564_v57, %v901_v7  ;;  %v899_v11 = vpop.xlane.xlu0 %898  ;;  %v2610_v7 = vld [vmem:[#allocation2 + $0x60] sm:$0xff] }
 0x25a   :  { %v2581_v53 = vmax.f32 %v2570_v50, %v899_v11  ;;  %2903 = vst [vmem:[#allocation10_spill] sm:$0xff] %v2610_v7 }
 0x25b   :  { %1210 = vst.msk [vmem:[#allocation2 + $0x58] sm:$0xff] %vm275_vm2, %v2578_v62  ;;  %1063 = vperm.xlu0 %1569, %v2578_v62  }
 0x25c   :  { %1209 = vst.msk [vmem:[#allocation2 + $0x50] sm:$0xff] %vm275_vm2, %v2581_v53  ;;  %v889_v11 = vpop.xlane.xlu1 %888  ;;  %1058 = vperm.xlu1 %1570, %v2581_v53  }
 0x25d   :  { %v2598_v3 = vmax.f32 %v2583_v14, %v889_v11  ;;  %v887_v47 = vpop.xlane.xlu0 %886  ;;  %v2630_v11 = vld [vmem:[#allocation2 + $0x30] sm:$0xff] }
 0x25e   :  { %v2601_v29 = vmax.f32 %v2590_v9, %v887_v47  ;;  %v2643_v9 = vld [vmem:[#allocation2 + $0x78] sm:$0xff] }
 0x25f   :  { %2900 = vst [vmem:[#allocation7_spill] sm:$0xff] %v2598_v3  ;;  %1204 = vst.msk [vmem:[#allocation2 + $0x28] sm:$0xff] %vm275_vm2, %v2598_v3  ;;  %1018 = vperm.xlu0 %1569, %v2562_v52  }
 0x260   :  { %2901 = vst [vmem:[#allocation8_spill] sm:$0xff] %v2601_v29  ;;  %1203 = vst.msk [vmem:[#allocation2 + $0x20] sm:$0xff] %vm275_vm2, %v2601_v29  ;;  %v905_v47 = vpop.xlane.xlu1 %904  ;;  %1028 = vperm.xlu1 %1570, %v2601_v29  }
 0x261   :  { %v2618_v40 = vmax.f32 %v2603_v54, %v905_v47  ;;  %v903_v37 = vpop.xlane.xlu0 %902  ;;  %2907 = vst [vmem:[#allocation14_spill] sm:$0xff] %v2643_v9  ;;  %v2650_v47 = vld [vmem:[#allocation2 + $0x70] sm:$0xff] }
 0x262   :  { %v2621_v16 = vmax.f32 %v2610_v7, %v903_v37  ;;  %v452_v7 = vsel %vm62_vm0, %v2237_v49, 0.0  ;;  %v467_v49 = vsel %vm62_vm0, %v2259_v5, 0.0  ;;  %v479_v5 = vsel %vm62_vm0, %v2293_v30, 0.0 }
 0x263   :  { %1212 = vst.msk [vmem:[#allocation2 + $0x68] sm:$0xff] %vm275_vm2, %v2618_v40  ;;  %1033 = vperm.xlu0 %1569, %v2598_v3  }
 0x264   :  { %2904 = vst [vmem:[#allocation11_spill] sm:$0xff] %v2621_v16  ;;  %1211 = vst.msk [vmem:[#allocation2 + $0x60] sm:$0xff] %vm275_vm2, %v2621_v16  ;;  %v893_v37 = vpop.xlane.xlu1 %892  ;;  %1068 = vperm.xlu1 %1570, %v2621_v16  }
 0x265   :  { %v2638_v29 = vmax.f32 %v2623_v44, %v893_v37  ;;  %v891_v14 = vpop.xlane.xlu0 %890  ;;  %v458_v37 = vsel %vm62_vm0, %v2245_v15, 0.0  ;;  %v473_v15 = vsel %vm62_vm0, %v2278_v18, 0.0  ;;  %v482_v18 = vsel %vm62_vm0, %v2302_v38, 0.0 }
 0x266   :  { %v2641_v54 = vmax.f32 %v2630_v11, %v891_v14 }
 0x267   :  { %1206 = vst.msk [vmem:[#allocation2 + $0x38] sm:$0xff] %vm275_vm2, %v2638_v29  ;;  %1073 = vperm.xlu0 %1569, %v2618_v40  }
 0x268   :  { %2906 = vst [vmem:[#allocation13_spill] sm:$0xff] %v2641_v54  ;;  %1205 = vst.msk [vmem:[#allocation2 + $0x30] sm:$0xff] %vm275_vm2, %v2641_v54  ;;  %v909_v14 = vpop.xlane.xlu1 %908  ;;  %1038 = vperm.xlu1 %1570, %v2641_v54   ;;  %v455_v54 = vsel %vm62_vm0, %v2233_v60, 0.0  ;;  %v470_v60 = vsel %vm62_vm0, %v2280_v63, 0.0 }
 0x269   :  { %v2658_v16 = vmax.f32 %v2643_v9, %v909_v14  ;;  %v907_v3 = vpop.xlane.xlu0 %906  ;;  %v400_v14 = vmax.f32 %v2512_v12, 1e-24  ;;  %v464_v12 = vsel %vm62_vm0, %v2261_v10, 0.0  ;;  %v1735_v10 = vld [vmem:[%s2881_s1 + $0x60] sm:$0xff] }
 0x26a   :  { %v2661_v44 = vmax.f32 %v2650_v47, %v907_v3 }
 0x26b   :  { %1214 = vst.msk [vmem:[#allocation2 + $0x78] sm:$0xff] %vm275_vm2, %v2658_v16  ;;  %1043 = vperm.xlu0 %1569, %v2638_v29   ;;  %1659 = vrsqrt.f32 %v400_v14 }
 0x26c   :  { %2908 = vst [vmem:[#allocation15_spill] sm:$0xff] %v2661_v44  ;;  %1213 = vst.msk [vmem:[#allocation2 + $0x70] sm:$0xff] %vm275_vm2, %v2661_v44  ;;  %1078 = vperm.xlu1 %1570, %v2661_v44   ;;  %v381_v3 = vpop.xlane.xlu1 %380  ;;  %v461_v44 = vsel %vm62_vm0, %v2243_v43, 0.0  ;;  %v476_v43 = vsel %vm62_vm0, %v2296_v32, 0.0  ;;  %v485_v32 = vsel %vm62_vm0, %v2305_v17, 0.0 }
 0x26d   :  { %v401_v9 = vmax.f32 %v381_v3, 1e-24 }
 0x26f   :  { %1083 = vperm.xlu0 %1569, %v2658_v16   ;;  %1661 = vrsqrt.f32 %v401_v9 }
 0x28e   :  { %453 = vadd.xlane.f32.xlu0 %v452_v7 }
 0x290   :  { %456 = vadd.xlane.f32.xlu1 %v455_v54  ;;  %v1660_v54 = vpop.eup %1659 }
 0x291   :  { %v1662_v9 = vpop.eup %1661 }
 0x292   :  { %459 = vadd.xlane.f32.xlu0 %v458_v37  ;;  %v433_v63 = vmul.f32 %v1662_v9, %v2483_v56  ;;  %v2909_v56 = vmov 0.0  }
 0x293   :  { %1364 = vst.msk [vmem:[%s2882_s3 + $0x10] sm:$0xff] %vm275_vm2, %v2909_v56  ;;  %1365 = vst.msk [vmem:[%s2882_s3 + $0x18] sm:$0xff] %vm275_vm2, %v2909_v56 }
 0x294   :  { %462 = vadd.xlane.f32.xlu1 %v461_v44  ;;  %v432_v44 = vmul.f32 %v1735_v10, %v1660_v54  ;;  %v449_v37 = vmul.f32 %v433_v63, %v2268_v42  ;;  %1366 = vst.msk [vmem:[%s2882_s3 + $0x20] sm:$0xff] %vm275_vm2, %v2909_v56  ;;  %1367 = vst.msk [vmem:[%s2882_s3 + $0x28] sm:$0xff] %vm275_vm2, %v2909_v56 }
 0x295   :  { %1368 = vst.msk [vmem:[%s2882_s3 + $0x30] sm:$0xff] %vm275_vm2, %v2909_v56  ;;  %1369 = vst.msk [vmem:[%s2882_s3 + $0x38] sm:$0xff] %vm275_vm2, %v2909_v56 }
 0x296   :  { %465 = vadd.xlane.f32.xlu0 %v464_v12  ;;  %v448_v7 = vmul.f32 %v432_v44, %v2257_v21  ;;  %v491_v30 = vsel %vm62_vm0, %v449_v37, 0.0  ;;  %1370 = vst.msk [vmem:[%s2882_s3 + $0x40] sm:$0xff] %vm275_vm2, %v2909_v56  ;;  %1371 = vst.msk [vmem:[%s2882_s3 + $0x48] sm:$0xff] %vm275_vm2, %v2909_v56  ;;  %v2777_v21 = vpop.xlane.xlu1 %383 }
 0x297   :  { %1372 = vst.msk [vmem:[%s2882_s3 + $0x50] sm:$0xff] %vm275_vm2, %v2909_v56  ;;  %1373 = vst.msk [vmem:[%s2882_s3 + $0x58] sm:$0xff] %vm275_vm2, %v2909_v56 }
 0x298   :  { %468 = vadd.xlane.f32.xlu1 %v467_v49  ;;  %v488_v3 = vsel %vm62_vm0, %v448_v7, 0.0  ;;  %1374 = vst.msk [vmem:[%s2882_s3 + $0x60] sm:$0xff] %vm275_vm2, %v2909_v56  ;;  %1375 = vst.msk [vmem:[%s2882_s3 + $0x68] sm:$0xff] %vm275_vm2, %v2909_v56 }
 0x299   :  { %1376 = vst.msk [vmem:[%s2882_s3 + $0x70] sm:$0xff] %vm275_vm2, %v2909_v56  ;;  %1377 = vst.msk [vmem:[%s2882_s3 + $0x78] sm:$0xff] %vm275_vm2, %v2909_v56 }
 0x29a   :  { %471 = vadd.xlane.f32.xlu0 %v470_v60  ;;  %v2779_v42 = vpop.xlane.xlu1 %386 }
 0x29c   :  { %474 = vadd.xlane.f32.xlu1 %v473_v15 }
 0x29e   :  { %477 = vadd.xlane.f32.xlu0 %v476_v43 }
 0x2a0   :  { %480 = vadd.xlane.f32.xlu1 %v479_v5 }
 0x2a2   :  { %483 = vadd.xlane.f32.xlu0 %v482_v18 }
 0x2a4   :  { %486 = vadd.xlane.f32.xlu1 %v485_v32 }
 0x2a6   :  { %489 = vadd.xlane.f32.xlu0 %v488_v3 }
 0x2a8   :  { %492 = vadd.xlane.f32.xlu1 %v491_v30 }
 0x2ce   :  { %v1014_v38 = vpop.permute.xlu0 %1013 }
 0x2cf   :  { %v1087_v17 = vsub.f32 %v2385_v4, %v1014_v38  ;;  %v1009_v14 = vpop.permute.xlu1 %1008 }
 0x2d0   :  { %v1086_v60 = vsub.f32 %v2390_v59, %v1009_v14 }
 0x2d1   :  { %v1104_v12 = vmul.f32 1.442695, %v1087_v17 }
 0x2d2   :  { %v1054_v49 = vpop.permute.xlu0 %1053  ;;  %v1102_v44 = vmul.f32 1.442695, %v1086_v60 }
 0x2d3   :  { %1663 = vpow2.f32 %v1104_v12  ;;  %v1095_v54 = vsub.f32 %v2397_v25, %v1054_v49  ;;  %v1049_v15 = vpop.permute.xlu1 %1048 }
 0x2d4   :  { %v1094_v9 = vsub.f32 %v2402_v0, %v1049_v15 }
 0x2d5   :  { %v1120_v43 = vmul.f32 1.442695, %v1095_v54 }
 0x2d6   :  { %v1118_v10 = vmul.f32 1.442695, %v1094_v9 }
 0x2d7   :  { %1665 = vpow2.f32 %v1120_v43  ;;  %v1024_v5 = vpop.permute.xlu1 %1023 }
 0x2d8   :  { %1667 = vpow2.f32 %v1118_v10  ;;  %v1089_v63 = vsub.f32 %v2413_v1, %v1024_v5 }
 0x2d9   :  { %1669 = vpow2.f32 %v1102_v44 }
 0x2da   :  { %v1064_v4 = vpop.permute.xlu0 %1063  ;;  %v1108_v18 = vmul.f32 1.442695, %v1089_v63 }
 0x2db   :  { %v1097_v7 = vsub.f32 %v2428_v19, %v1064_v4  ;;  %v1059_v32 = vpop.permute.xlu1 %1058 }
 0x2dc   :  { %v1096_v25 = vsub.f32 %v2433_v35, %v1059_v32  ;;  %1671 = vpow2.f32 %v1108_v18  ;;  %v402_v18 = vmax.f32 %v2777_v21, 1e-24 }
 0x2dd   :  { %v1664_v59 = vpop.eup %1663  ;;  %v1124_v37 = vmul.f32 1.442695, %v1097_v7 }
 0x2de   :  { %1136 = vadd.xlane.f32.xlu0 %v1664_v59  ;;  %v1019_v0 = vpop.permute.xlu0 %1018  ;;  %v1122_v1 = vmul.f32 1.442695, %v1096_v25 }
 0x2df   :  { %v1088_v3 = vsub.f32 %v2418_v13, %v1019_v0  ;;  %v1029_v30 = vpop.permute.xlu1 %1028  ;;  %1673 = vpow2.f32 %v1124_v37 }
 0x2e0   :  { %v1090_v14 = vsub.f32 %v2450_v48, %v1029_v30  ;;  %v403_v48 = vmax.f32 %v2779_v42, 1e-24 }
 0x2e1   :  { %v1666_v56 = vpop.eup %1665  ;;  %v1106_v38 = vmul.f32 1.442695, %v1088_v3 }
 0x2e2   :  { %v1668_v17 = vpop.eup %1667  ;;  %1152 = vadd.xlane.f32.xlu1 %v1666_v56  ;;  %v1034_v19 = vpop.permute.xlu0 %1033  ;;  %v1110_v54 = vmul.f32 1.442695, %v1090_v14 }
 0x2e3   :  { %1675 = vpow2.f32 %v1106_v38  ;;  %v1091_v12 = vsub.f32 %v2445_v22, %v1034_v19  ;;  %v1069_v49 = vpop.permute.xlu1 %1068  ;;  %1150 = vadd.xlane.f32.xlu0 %v1668_v17  ;;  %v1670_v35 = vpop.eup %1669 }
 0x2e4   :  { %1677 = vpow2.f32 %v1122_v1  ;;  %v1098_v13 = vsub.f32 %v2464_v23, %v1069_v49 }
 0x2e5   :  { %v1112_v60 = vmul.f32 1.442695, %v1091_v12 }
 0x2e6   :  { %1134 = vadd.xlane.f32.xlu1 %v1670_v35  ;;  %v1074_v15 = vpop.permute.xlu0 %1073  ;;  %v1672_v10 = vpop.eup %1671  ;;  %v1126_v22 = vmul.f32 1.442695, %v1098_v13 }
 0x2e7   :  { %1679 = vpow2.f32 %v1112_v60  ;;  %v1099_v9 = vsub.f32 %v2460_v24, %v1074_v15  ;;  %v1039_v43 = vpop.permute.xlu1 %1038 }
 0x2e8   :  { %1681 = vpow2.f32 %v1110_v54  ;;  %v1092_v5 = vsub.f32 %v2476_v36, %v1039_v43 }
 0x2e9   :  { %v1128_v44 = vmul.f32 1.442695, %v1099_v9  ;;  %v1674_v23 = vpop.eup %1673 }
 0x2ea   :  { %1140 = vadd.xlane.f32.xlu1 %v1672_v10  ;;  %v1044_v63 = vpop.permute.xlu0 %1043  ;;  %v1114_v42 = vmul.f32 1.442695, %v1092_v5 }
 0x2eb   :  { %1683 = vpow2.f32 %v1128_v44  ;;  %v1093_v4 = vsub.f32 %v2473_v27, %v1044_v63  ;;  %v1079_v7 = vpop.permute.xlu1 %1078 }
 0x2ec   :  { %1685 = vrsqrt.f32 %v403_v48  ;;  %v1100_v36 = vsub.f32 %v2489_v45, %v1079_v7 }
 0x2ed   :  { %v1676_v24 = vpop.eup %1675  ;;  %v1116_v32 = vmul.f32 1.442695, %v1093_v4  ;;  %1687 = vpow2.f32 %v1126_v22  ;;  %v2910_v4 = vsub.f32 %v2514_v2, %v2519_v20  ;;  %v2914_v2 = vsub.f32 %v2544_v61, %v2559_v8 }
 0x2ee   :  { %1156 = vadd.xlane.f32.xlu1 %v1674_v23  ;;  %1138 = vadd.xlane.f32.xlu0 %v1676_v24  ;;  %v1084_v59 = vpop.permute.xlu0 %1083  ;;  %v1678_v25 = vpop.eup %1677  ;;  %v1130_v21 = vmul.f32 1.442695, %v1100_v36  ;;  %v2912_v24 = vsub.f32 %v2531_v51, %v2542_v6  ;;  %v2916_v51 = vsub.f32 %v2564_v57, %v2578_v62  ;;  %v2917_v61 = vsub.f32 %v2570_v50, %v2581_v53 }
 0x2ef   :  { %1689 = vpow2.f32 %v1116_v32  ;;  %v1101_v37 = vsub.f32 %v2486_v55, %v1084_v59  ;;  %v960_v23 = vmul.f32 1.442695, %v2910_v4  ;;  %v964_v20 = vmul.f32 1.442695, %v2914_v2 }
 0x2f0   :  { %1691 = vrsqrt.f32 %v402_v18  ;;  %v2911_v18 = vsub.f32 %v2524_v33, %v2539_v46  ;;  %v974_v32 = vmul.f32 1.442695, %v2912_v24  ;;  %v2915_v33 = vsub.f32 %v2551_v41, %v2562_v52  ;;  %v2918_v41 = vld [vmem:[#allocation5_spill] sm:$0xff]  ;;  %v2919_v52 = vld [vmem:[#allocation7_spill] sm:$0xff] }
 0x2f1   :  { %v1680_v27 = vpop.eup %1679  ;;  %v1132_v0 = vmul.f32 1.442695, %v1101_v37  ;;  %1693 = vpow2.f32 %v1114_v42  ;;  %v2913_v42 = vsub.f32 %v2516_v26, %v2522_v34  ;;  %v927_v37 = vld [vmem:[#allocation3 + $0x8] sm:$0xff]  ;;  %v980_v6 = vmul.f32 1.442695, %v2916_v51 }
 0x2f2   :  { %1154 = vadd.xlane.f32.xlu0 %v1678_v25  ;;  %1144 = vadd.xlane.f32.xlu1 %v1680_v27  ;;  %v1682_v3 = vpop.eup %1681  ;;  %v976_v7 = vmul.f32 1.442695, %v2911_v18  ;;  %v962_v46 = vmul.f32 1.442695, %v2915_v33  ;;  %v935_v27 = vld [vmem:[#allocation3 + $0x48] sm:$0xff]  ;;  %v928_v18 = vld [vmem:[#allocation3 + $0x10] sm:$0xff] }
 0x2f3   :  { %1695 = vpow2.f32 %v1132_v0  ;;  %v958_v59 = vmul.f32 1.442695, %v2913_v42  ;;  %v978_v8 = vmul.f32 1.442695, %v2917_v61 }
 0x2f4   :  { %1697 = vpow2.f32 %v1130_v21 }
 0x2f5   :  { %v1684_v30 = vpop.eup %1683  ;;  %1699 = vpow2.f32 %v960_v23  ;;  %v937_v23 = vld [vmem:[#allocation3 + $0x58] sm:$0xff] }
 0x2f6   :  { %v1686_v56 = vpop.eup %1685  ;;  %1142 = vadd.xlane.f32.xlu0 %v1682_v3  ;;  %1160 = vadd.xlane.f32.xlu1 %v1684_v30  ;;  %1701 = vpow2.f32 %v976_v7  ;;  %v934_v3 = vld [vmem:[#allocation3 + $0x40] sm:$0xff]  ;;  %v2920_v30 = vsub.f32 %v2918_v41, %v2919_v52 }
 0x2f7   :  { %v1688_v38 = vpop.eup %1687  ;;  %v435_v45 = vmul.f32 %v1686_v56, %v2506_v28  ;;  %1703 = vpow2.f32 %v974_v32  ;;  %v2931_v7 = vld [vmem:[#allocation13_spill] sm:$0xff] }
 0x2f8   :  { %1705 = vpow2.f32 %v958_v59  ;;  %v968_v56 = vmul.f32 1.442695, %v2920_v30  ;;  %v2932_v24 = vsub.f32 %v2630_v11, %v2931_v7  ;;  %v2933_v59 = vld [vmem:[#allocation14_spill] sm:$0xff] }
 0x2f9   :  { %v1690_v17 = vpop.eup %1689  ;;  %v451_v19 = vmul.f32 %v435_v45, %v2287_v31  ;;  %1707 = vpow2.f32 %v964_v20  ;;  %v926_v45 = vld [vmem:[#allocation3] sm:$0xff]  ;;  %v939_v30 = vld [vmem:[#allocation3 + $0x68] sm:$0xff] }
 0x2fa   :  { %v1692_v55 = vpop.eup %1691  ;;  %1158 = vadd.xlane.f32.xlu0 %v1688_v38  ;;  %1148 = vadd.xlane.f32.xlu1 %v1690_v17  ;;  %1709 = vpow2.f32 %v962_v46  ;;  %v970_v32 = vmul.f32 1.442695, %v2932_v24 }
 0x2fb   :  { %v1694_v1 = vpop.eup %1693  ;;  %v434_v12 = vmul.f32 %v1692_v55, %v2496_v58  ;;  %v497_v35 = vsel %vm62_vm0, %v451_v19, 0.0  ;;  %1711 = vpow2.f32 %v980_v6  ;;  %v2921_v55 = vld [vmem:[#allocation6_spill] sm:$0xff] }
 0x2fc   :  { %1713 = vpow2.f32 %v978_v8  ;;  %v931_v6 = vld [vmem:[#allocation3 + $0x28] sm:$0xff] }
 0x2fd   :  { %v1696_v14 = vpop.eup %1695  ;;  %v450_v60 = vmul.f32 %v434_v12, %v2276_v39  ;;  %1715 = vpow2.f32 %v968_v56  ;;  %v2924_v12 = vld [vmem:[#allocation9_spill] sm:$0xff] }
 0x2fe   :  { %1146 = vadd.xlane.f32.xlu0 %v1694_v1  ;;  %1164 = vadd.xlane.f32.xlu1 %v1696_v14  ;;  %v1698_v49 = vpop.eup %1697  ;;  %v2922_v1 = vld [vmem:[#allocation8_spill] sm:$0xff]  ;;  %v930_v56 = vld [vmem:[#allocation3 + $0x20] sm:$0xff] }
 0x2ff   :  { %v494_v28 = vsel %vm62_vm0, %v450_v60, 0.0  ;;  %v1700_v36 = vpop.eup %1699  ;;  %v2923_v14 = vsub.f32 %v2921_v55, %v2922_v1 }
 0x300   :  { %v991_v26 = vmul.f32 %v1700_v36, %v927_v37  ;;  %v1702_v34 = vpop.eup %1701 }
 0x301   :  { %v1704_v0 = vpop.eup %1703  ;;  %v999_v57 = vmul.f32 %v1702_v34, %v935_v27  ;;  %v966_v50 = vmul.f32 1.442695, %v2923_v14 }
 0x302   :  { %1162 = vadd.xlane.f32.xlu0 %v1698_v49  ;;  %498 = vadd.xlane.f32.xlu1 %v497_v35  ;;  %v1706_v62 = vpop.eup %1705  ;;  %v998_v17 = vmul.f32 %v1704_v0, %v934_v3  ;;  %v2925_v49 = vsub.f32 %v2924_v12, %v2618_v40  ;;  %v933_v12 = vld [vmem:[#allocation3 + $0x38] sm:$0xff] }
 0x303   :  { %1717 = vpow2.f32 %v966_v50 }
 0x304   :  { %v984_v35 = vmul.f32 1.442695, %v2925_v49  ;;  %v938_v49 = vld [vmem:[#allocation3 + $0x60] sm:$0xff] }
 0x306   :  { %495 = vadd.xlane.f32.xlu0 %v494_v28  ;;  %v990_v28 = vmul.f32 %v1706_v62, %v926_v45  ;;  %1719 = vpow2.f32 %v984_v35  ;;  %v1267_v45 = vld [vmem:[#allocation2 + $0x8] sm:$0xff] }
 0x31b   :  { %v454_v54 = vpop.xlane.xlu0 %453 }
 0x31c   :  { %500 = vst.msk [vmem:[#allocation4] sm:$0xff] %vm275_vm2, %v454_v54  ;;  %v1708_v54 = vpop.eup %1707 }
 0x31d   :  { %v457_v13 = vpop.xlane.xlu1 %456 }
 0x31e   :  { %501 = vst.msk [vmem:[#allocation4 + $0x8] sm:$0xff] %vm275_vm2, %v457_v13 }
 0x31f   :  { %v460_v31 = vpop.xlane.xlu0 %459 }
 0x320   :  { %v929_v31 = vld [vmem:[#allocation3 + $0x18] sm:$0xff] }
 0x321   :  { %v463_v58 = vpop.xlane.xlu1 %462 }
 0x322   :  { %v2926_v58 = vld [vmem:[#allocation10_spill] sm:$0xff] }
 0x323   :  { %v466_v15 = vpop.xlane.xlu0 %465 }
 0x324   :  { %v2927_v15 = vld [vmem:[#allocation11_spill] sm:$0xff] }
 0x325   :  { %v469_v9 = vpop.xlane.xlu1 %468  ;;  %v1299_v35 = vld [vmem:[#allocation4 + $0x8] sm:$0xff] }
 0x326   :  { %v2928_v9 = vsub.f32 %v2926_v58, %v2927_v15 }
 0x327   :  { %v472_v43 = vpop.xlane.xlu0 %471 }
 0x328   :  { %v982_v43 = vmul.f32 1.442695, %v2928_v9 }
 0x329   :  { %v475_v48 = vpop.xlane.xlu1 %474 }
 0x32b   :  { %v478_v10 = vpop.xlane.xlu0 %477 }
 0x32c   :  { %v2929_v10 = vld [vmem:[#allocation12_spill] sm:$0xff] }
 0x32d   :  { %v481_v44 = vpop.xlane.xlu1 %480  ;;  %v2930_v40 = vsub.f32 %v2929_v10, %v2638_v29  ;;  %v2934_v29 = vsub.f32 %v2933_v59, %v2658_v16  ;;  %v932_v10 = vld [vmem:[#allocation3 + $0x30] sm:$0xff] }
 0x32f   :  { %v484_v39 = vpop.xlane.xlu0 %483  ;;  %v972_v44 = vmul.f32 1.442695, %v2930_v40  ;;  %v988_v2 = vmul.f32 1.442695, %v2934_v29 }
 0x331   :  { %v487_v22 = vpop.xlane.xlu1 %486 }
 0x332   :  { %v1710_v22 = vpop.eup %1709 }
 0x333   :  { %v490_v5 = vpop.xlane.xlu0 %489  ;;  %v992_v37 = vmul.f32 %v1710_v22, %v928_v18 }
 0x334   :  { %v993_v5 = vmul.f32 %v1708_v54, %v929_v31 }
 0x335   :  { %v493_v63 = vpop.xlane.xlu1 %492 }
 0x336   :  { %v1712_v63 = vpop.eup %1711 }
 0x337   :  { %v1714_v20 = vpop.eup %1713  ;;  %v1001_v36 = vmul.f32 %v1712_v63, %v937_v23 }
 0x338   :  { %v1716_v33 = vpop.eup %1715 }
 0x339   :  { %v1718_v61 = vpop.eup %1717  ;;  %v995_v8 = vmul.f32 %v1716_v33, %v931_v6 }
 0x33a   :  { %v1720_v3 = vpop.eup %1719  ;;  %v994_v1 = vmul.f32 %v1718_v61, %v930_v56 }
 0x33b   :  { %v1003_v55 = vmul.f32 %v1720_v3, %v939_v30 }
 0x36b   :  { %v1137_v25 = vpop.xlane.xlu0 %1136 }
 0x36c   :  { %v1167_v21 = vadd.f32 %v1137_v25, %v991_v26  ;;  %v936_v26 = vld [vmem:[#allocation3 + $0x50] sm:$0xff] }
 0x36d   :  { %v2935_v25 = vld [vmem:[#allocation15_spill] sm:$0xff] }
 0x36e   :  { %1184 = vst.msk [vmem:[#allocation3 + $0x8] sm:$0xff] %vm275_vm2, %v1167_v21  ;;  %v2936_v27 = vsub.f32 %v2650_v47, %v2935_v25  ;;  %v1000_v21 = vmul.f32 %v1714_v20, %v936_v26 }
 0x36f   :  { %v1153_v38 = vpop.xlane.xlu1 %1152 }
 0x370   :  { %v1175_v53 = vadd.f32 %v1153_v38, %v999_v57  ;;  %v1151_v19 = vpop.xlane.xlu0 %1150  ;;  %v986_v0 = vmul.f32 1.442695, %v2936_v27 }
 0x371   :  { %v1174_v60 = vadd.f32 %v1151_v19, %v998_v17 }
 0x372   :  { %1192 = vst.msk [vmem:[#allocation3 + $0x48] sm:$0xff] %vm275_vm2, %v1175_v53 }
 0x373   :  { %1191 = vst.msk [vmem:[#allocation3 + $0x40] sm:$0xff] %vm275_vm2, %v1174_v60  ;;  %v1135_v13 = vpop.xlane.xlu1 %1134 }
 0x374   :  { %v1166_v48 = vadd.f32 %v1135_v13, %v990_v28 }
 0x375   :  { %v1219_v39 = vld [vmem:[#allocation3 + $0x8] sm:$0xff] }
 0x376   :  { %1721 = vlog2.f32 %v1219_v39  ;;  %1183 = vst.msk [vmem:[#allocation3] sm:$0xff] %vm275_vm2, %v1166_v48  ;;  %v941_v48 = vld [vmem:[#allocation3 + $0x78] sm:$0xff] }
 0x377   :  { %v1141_v4 = vpop.xlane.xlu1 %1140  ;;  %1723 = vpow2.f32 %v982_v43 }
 0x378   :  { %v1169_v42 = vadd.f32 %v1141_v4, %v993_v5  ;;  %1725 = vpow2.f32 %v972_v44  ;;  %v1266_v5 = vld [vmem:[#allocation2] sm:$0xff] }
 0x379   :  { %1727 = vpow2.f32 %v970_v32  ;;  %v940_v32 = vld [vmem:[#allocation3 + $0x70] sm:$0xff] }
 0x37a   :  { %1186 = vst.msk [vmem:[#allocation3 + $0x18] sm:$0xff] %vm275_vm2, %v1169_v42  ;;  %1729 = vpow2.f32 %v988_v2  ;;  %v1298_v42 = vld [vmem:[#allocation4] sm:$0xff] }
 0x37b   :  { %v1157_v46 = vpop.xlane.xlu1 %1156  ;;  %v1139_v51 = vpop.xlane.xlu0 %1138 }
 0x37c   :  { %v1177_v34 = vadd.f32 %v1157_v46, %v1001_v36  ;;  %v1168_v11 = vadd.f32 %v1139_v51, %v992_v37 }
 0x37d   :  { %v1218_v16 = vld [vmem:[#allocation3] sm:$0xff] }
 0x37e   :  { %1731 = vlog2.f32 %v1218_v16  ;;  %1194 = vst.msk [vmem:[#allocation3 + $0x58] sm:$0xff] %vm275_vm2, %v1177_v34  ;;  %1185 = vst.msk [vmem:[#allocation3 + $0x10] sm:$0xff] %vm275_vm2, %v1168_v11 }
 0x37f   :  { %v1145_v41 = vpop.xlane.xlu1 %1144  ;;  %v1155_v52 = vpop.xlane.xlu0 %1154  ;;  %1733 = vpow2.f32 %v986_v0 }
 0x380   :  { %v1722_v57 = vpop.eup %1721  ;;  %v1171_v62 = vadd.f32 %v1145_v41, %v995_v8  ;;  %v1176_v38 = vadd.f32 %v1155_v52, %v1000_v21 }
 0x381   :  { %v1237_v47 = vmul.f32 0.6931472, %v1722_v57  ;;  %v1724_v17 = vpop.eup %1723 }
 0x382   :  { %1188 = vst.msk [vmem:[#allocation3 + $0x28] sm:$0xff] %vm275_vm2, %v1171_v62  ;;  %1193 = vst.msk [vmem:[#allocation3 + $0x50] sm:$0xff] %vm275_vm2, %v1176_v38  ;;  %v1726_v14 = vpop.eup %1725  ;;  %v1002_v58 = vmul.f32 %v1724_v17, %v938_v49 }
 0x383   :  { %v1283_v50 = vadd.f32 %v1267_v45, %v1237_v47  ;;  %v1161_v53 = vpop.xlane.xlu1 %1160  ;;  %v1143_v19 = vpop.xlane.xlu0 %1142  ;;  %v997_v31 = vmul.f32 %v1726_v14, %v933_v12 }
 0x384   :  { %v1179_v60 = vadd.f32 %v1161_v53, %v1003_v55  ;;  %v1170_v28 = vadd.f32 %v1143_v19, %v994_v1  ;;  %v1728_v13 = vpop.eup %1727 }
 0x385   :  { %v1315_v54 = vsub.f32 %v1283_v50, %v1299_v35  ;;  %v1730_v15 = vpop.eup %1729  ;;  %v996_v4 = vmul.f32 %v1728_v13, %v932_v10 }
 0x386   :  { %1196 = vst.msk [vmem:[#allocation3 + $0x68] sm:$0xff] %vm275_vm2, %v1179_v60  ;;  %1187 = vst.msk [vmem:[#allocation3 + $0x20] sm:$0xff] %vm275_vm2, %v1170_v28  ;;  %v1005_v63 = vmul.f32 %v1730_v15, %v941_v48 }
 0x387   :  { %1363 = vst.msk [vmem:[%s2882_s3 + $0x8] sm:$0xff] %vm275_vm2, %v1315_v54  ;;  %v1149_v9 = vpop.xlane.xlu1 %1148  ;;  %v1159_v43 = vpop.xlane.xlu0 %1158 }
 0x388   :  { %v1732_v40 = vpop.eup %1731  ;;  %v1173_v44 = vadd.f32 %v1149_v9, %v997_v31  ;;  %v1178_v39 = vadd.f32 %v1159_v43, %v1002_v58 }
 0x389   :  { %v1235_v22 = vmul.f32 0.6931472, %v1732_v40  ;;  %v1734_v23 = vpop.eup %1733 }
 0x38a   :  { %1190 = vst.msk [vmem:[#allocation3 + $0x38] sm:$0xff] %vm275_vm2, %v1173_v44  ;;  %1195 = vst.msk [vmem:[#allocation3 + $0x60] sm:$0xff] %vm275_vm2, %v1178_v39  ;;  %v1004_v20 = vmul.f32 %v1734_v23, %v940_v32 }
 0x38b   :  { %v1282_v18 = vadd.f32 %v1266_v5, %v1235_v22  ;;  %v1165_v7 = vpop.xlane.xlu1 %1164  ;;  %v1147_v24 = vpop.xlane.xlu0 %1146 }
 0x38c   :  { %v1181_v59 = vadd.f32 %v1165_v7, %v1005_v63  ;;  %v1172_v29 = vadd.f32 %v1147_v24, %v996_v4 }
 0x38d   :  { %v1314_v2 = vsub.f32 %v1282_v18, %v1298_v42 }
 0x38e   :  { %1198 = vst.msk [vmem:[#allocation3 + $0x78] sm:$0xff] %vm275_vm2, %v1181_v59  ;;  %1189 = vst.msk [vmem:[#allocation3 + $0x30] sm:$0xff] %vm275_vm2, %v1172_v29 }
 0x38f   :  { %1362 = vst.msk [vmem:[%s2882_s3] sm:$0xff] %vm275_vm2, %v1314_v2  ;;  %v499_v36 = vpop.xlane.xlu1 %498  ;;  %v1163_v37 = vpop.xlane.xlu0 %1162 }
 0x390   :  { %v1180_v33 = vadd.f32 %v1163_v37, %v1004_v20 }
 0x392   :  { %1197 = vst.msk [vmem:[#allocation3 + $0x70] sm:$0xff] %vm275_vm2, %v1180_v33 }
 0x393   :  { %v496_v46 = vpop.xlane.xlu0 %495 }

</bundles_post_ra>
